<compile_context>
chip_gen: v6e
topology: v6e:2x2x1
jax: 0.10.0
libtpu: 0.0.40
codegen_flags: <defaults>
</compile_context>

<pallas_src>
import jax
import jax.numpy as jnp
from jax import lax
from jax.experimental import pallas as pl
from jax.experimental.pallas import tpu as pltpu

_VMEM_LIMIT = 32 * 1024 * 1024


# ----------------------------------------------------------------------------- text kernel

def _text_embed_kernel(words_ref, lang_hbm, pos_ref, out_ref, gath, sem):
    """Gather `chunk` vocab rows (HBM) with double-buffered cross-step prefetch and
    fuse the positional add."""
    chunk = pos_ref.shape[0]
    c = pl.program_id(0)            # chunk index (outer, "parallel")
    b = pl.program_id(1)            # batch index (inner, "arbitrary": carries prefetch)
    nb = pl.num_programs(1)
    base = c * chunk
    slot = b % 2

    def issue_rows(batch_idx, into_slot):
        # One row DMA per token; all stay in flight on the slot's semaphore.
        for t in range(chunk):
            tok = words_ref[batch_idx, base + t]
            pltpu.make_async_copy(
                lang_hbm.at[pl.ds(tok, 1), :],
                gath.at[into_slot, pl.ds(t, 1), :],
                sem.at[into_slot],
            ).start()

    # Prime the pipeline at the first batch row of each chunk.
    @pl.when(b == 0)
    def _():
        issue_rows(b, slot)

    # Prefetch the NEXT batch row's gathers before waiting on the current slot.
    @pl.when(b + 1 < nb)
    def _():
        issue_rows(b + 1, 1 - slot)

    # Single aggregate wait: chunk row-DMAs of Dt elements == one (chunk, Dt) transfer.
    pltpu.make_async_copy(gath.at[slot], gath.at[slot], sem.at[slot]).wait()

    out_ref[0] = (gath[slot] + pos_ref[...]).astype(out_ref.dtype)


def text_embedding(words, lang_table, text_pos_table, *, chunk=None):
    B, Lt = words.shape
    _, Dt = lang_table.shape
    if chunk is None:
        chunk = min(Lt, 256)          # amortize per-grid-step overhead, fits VMEM easily
    assert Lt % chunk == 0
    nc = Lt // chunk

    return pl.pallas_call(
        _text_embed_kernel,
        out_shape=jax.ShapeDtypeStruct((B, Lt, Dt), lang_table.dtype),
        grid_spec=pltpu.PrefetchScalarGridSpec(
            num_scalar_prefetch=1,                       # token ids -> SMEM
            grid=(nc, B),                                # B innermost: pos block reused
            in_specs=[
                pl.BlockSpec(memory_space=pl.ANY),       # vocab table stays in HBM
                pl.BlockSpec((chunk, Dt), lambda c, b, words: (c, 0)),  # pos rows
            ],
            out_specs=pl.BlockSpec((1, chunk, Dt), lambda c, b, words: (b, c, 0)),
            scratch_shapes=[
                pltpu.VMEM((2, chunk, Dt), lang_table.dtype),   # double-buffered gather
                pltpu.SemaphoreType.DMA((2,)),                  # one DMA sem per slot
            ],
        ),
        compiler_params=pltpu.CompilerParams(
            dimension_semantics=("parallel", "arbitrary"),
            vmem_limit_bytes=_VMEM_LIMIT),
    )(words, lang_table, text_pos_table)


# ----------------------------------------------------------------------------- layout kernel

def _layout_embed_kernel(bbox_ref, tables_ref, pos_ref, out_ref):
    """Six small-table gathers (shared-iota one-hot @ table on the MXU), fused
    positional add, written directly as per-table lane slabs (no concat)."""
    chunk = bbox_ref.shape[1]
    v_pad = tables_ref.shape[1]
    dl = tables_ref.shape[2]

    ids = bbox_ref[0]                                               # (chunk, 6) i32
    # Build the iota ONCE and reuse it for all six one-hot compares.
    iota = lax.broadcasted_iota(jnp.int32, (chunk, v_pad), 1)

    for c in range(6):
        # NOTE: out-of-range ids produce an all-zero row here (ref indexing would clamp);
        # valid inputs are always in range so semantics match.
        onehot = (ids[:, c:c + 1] == iota).astype(jnp.float32)      # (chunk, Vp)
        piece = jnp.dot(onehot, tables_ref[c],
                        preferred_element_type=jnp.float32)         # (chunk, Dl)
        out_ref[0, :, c * dl:(c + 1) * dl] = (
            piece + pos_ref[:, c * dl:(c + 1) * dl]).astype(out_ref.dtype)


def layout_embedding(bbox, coord_tables, box_pos_table, *, chunk=None):
    B, Lb, six = bbox.shape
    assert six == 6
    Dl = coord_tables[0].shape[1]
    D6 = 6 * Dl
    if chunk is None:
        chunk = min(Lb, 256)          # fills the 256-wide MXU on v6e/v7x
    assert Lb % chunk == 0
    nc = Lb // chunk

    # Pad every coordinate vocab to a common multiple of 128 (aligned one-hot lane /
    # matmul K dimension) and stack into one VMEM-resident, grid-invariant input.
    v_pad = max(pl.cdiv(t.shape[0], 128) * 128 for t in coord_tables)
    stacked = jnp.stack(
        [jnp.pad(t, ((0, v_pad - t.shape[0]), (0, 0))) for t in coord_tables])  # (6,Vp,Dl)

    return pl.pallas_call(
        _layout_embed_kernel,
        out_shape=jax.ShapeDtypeStruct((B, Lb, D6), box_pos_table.dtype),
        grid=(nc, B),                                   # B innermost: pos block reused
        in_specs=[
            pl.BlockSpec((1, chunk, 6), lambda c, b: (b, c, 0)),
            pl.BlockSpec((6, v_pad, Dl), lambda c, b: (0, 0, 0)),   # resident tables
            pl.BlockSpec((chunk, D6), lambda c, b: (c, 0)),
        ],
        out_specs=pl.BlockSpec((1, chunk, D6), lambda c, b: (b, c, 0)),
        compiler_params=pltpu.CompilerParams(
            dimension_semantics=("parallel", "parallel"),
            vmem_limit_bytes=_VMEM_LIMIT),
    )(bbox, stacked, box_pos_table)


# ----------------------------------------------------------------------------- module forward

def embedding_forward(tokenized_words, tokenized_bbox, p):
    text = text_embedding(tokenized_words, p['lang'], p['pos_t'])
    layout = layout_embedding(
        tokenized_bbox,
        (p['tlx'], p['tly'], p['brx'], p['bry'], p['w'], p['h']),
        p['pos_l'])
    return {'layout_feature': layout, 'text_feature': text}


# ----------------------------------------------------------------------------- pure-JAX reference

def embedding_forward_ref(words, bbox, p):
    Lt, Lb = words.shape[1], bbox.shape[1]
    text = p['lang'][words] + p['pos_t'][jnp.arange(Lt)][None]
    names = ('tlx', 'tly', 'brx', 'bry', 'w', 'h')
    feats = [p[n][bbox[:, :, i]] for i, n in enumerate(names)]
    layout = jnp.concatenate(feats, axis=-1) + p['pos_l'][jnp.arange(Lb)][None]
    return {'layout_feature': layout, 'text_feature': text}


# ----------------------------------------------------------------------------- params

def init_params(key, cfg):
    Dt, Dl = cfg['hidden_dim_t'], cfg['hidden_dim_l']
    ks = jax.random.split(key, 9)

    def rnd(k, shape):
        return 0.02 * jax.random.normal(k, shape, jnp.float32)

    return dict(
        lang=rnd(ks[0], (cfg['vocab_size'], Dt)),
        tlx=rnd(ks[1], (cfg['max_x_coord'], Dl)),
        tly=rnd(ks[2], (cfg['max_y_coord'], Dl)),
        brx=rnd(ks[3], (cfg['max_x_coord'], Dl)),
        bry=rnd(ks[4], (cfg['max_y_coord'], Dl)),
        w=rnd(ks[5], (cfg['max_x_coord'], Dl)),
        h=rnd(ks[6], (cfg['max_y_coord'], Dl)),
        pos_l=rnd(ks[7], (cfg['max_seq_len_l'] + 1, 6 * Dl)),
        pos_t=rnd(ks[8], (cfg['max_seq_len_t'] + 1, Dt)),
    )


# ----------------------------------------------------------------------------- main

if __name__ == "__main__":
    # Small shapes consistent with the module (real: vocab=50265, Dt=768, Dl=128,
    # max coords=1001, max seq=512).
    cfg = dict(vocab_size=512, hidden_dim_t=128, hidden_dim_l=32,
               max_x_coord=80, max_y_coord=80, max_seq_len_t=32, max_seq_len_l=32)
    B, text_len, box_len = 2, 16, 8

    key = jax.random.PRNGKey(0)
    k_w, k_b, k_p = jax.random.split(key, 3)
    words = jax.random.randint(k_w, (B, text_len), 0, cfg['vocab_size'], dtype=jnp.int32)
    bbox = jax.random.randint(k_b, (B, box_len, 6), 0,
                              min(cfg['max_x_coord'], cfg['max_y_coord']), dtype=jnp.int32)
    params = init_params(k_p, cfg)

    out = embedding_forward(words, bbox, params)
    out = jax.block_until_ready(out)

    ref = embedding_forward_ref(words, bbox, params)
    for name in ('text_feature', 'layout_feature'):
        a, b = out[name], ref[name]
        assert a.shape == b.shape and a.dtype == b.dtype, f"shape/dtype mismatch in {name}"
        assert jnp.allclose(a, b, atol=1e-5, rtol=1e-5), f"value mismatch in {name}"

    print("KERNEL_OK")
</pallas_src>

<mosaic_0001>
module attributes {stable_mosaic.version = 11 : i64} {
  func.func @_text_embed_kernel(%arg0: i32, %arg1: i32, %arg2: memref<2x16xi32, #tpu.memory_space<smem>>, %arg3: memref<512x128xf32, #tpu.memory_space<any>>, %arg4: memref<16x128xf32, #tpu.memory_space<vmem>>, %arg5: memref<1x16x128xf32, #tpu.memory_space<vmem>>, %arg6: memref<2x16x128xf32, #tpu.memory_space<vmem>>, %arg7: memref<2x!tpu.dma_semaphore, #tpu.memory_space<semaphore_mem>>) attributes {dimension_semantics = [#tpu.dimension_semantics<parallel>, #tpu.dimension_semantics<arbitrary>], iteration_bounds = array<i64: 1, 2>, scalar_prefetch = 1 : i64, scratch_operands = 2 : i64, tpu.core_type = #tpu.core_type<tc>, window_params = [{}, {transform_indices = @transform_1, window_bounds = array<i64: 16, 128>}, {transform_indices = @transform_2, window_bounds = array<i64: 1, 16, 128>}]} {
    %c16_i32 = arith.constant 16 : i32
    %0 = arith.muli %arg0, %c16_i32 : i32
    %c2_i32 = arith.constant 2 : i32
    %c0_i32 = arith.constant 0 : i32
    %1 = arith.cmpi eq, %c2_i32, %c0_i32 : i32
    %c1_i32 = arith.constant 1 : i32
    %2 = arith.select %1, %c1_i32, %c2_i32 : i32
    %3 = arith.remsi %arg1, %2 : i32
    %c0_i32_0 = arith.constant 0 : i32
    %4 = arith.cmpi ne, %3, %c0_i32_0 : i32
    %c0_i32_1 = arith.constant 0 : i32
    %5 = arith.cmpi slt, %3, %c0_i32_1 : i32
    %c0_i32_2 = arith.constant 0 : i32
    %6 = arith.cmpi slt, %2, %c0_i32_2 : i32
    %7 = arith.xori %5, %6 : i1
    %8 = arith.andi %7, %4 : i1
    %9 = arith.addi %3, %2 : i32
    %10 = arith.select %8, %9, %3 : i32
    %c0_i32_3 = arith.constant 0 : i32
    %11 = arith.cmpi eq, %arg1, %c0_i32_3 : i32
    %12 = arith.extui %11 : i1 to i32
    %c0_i32_4 = arith.constant 0 : i32
    %13 = arith.cmpi ne, %12, %c0_i32_4 : i32
    scf.if %13 {
      %c0_i32_18 = arith.constant 0 : i32
      %32 = arith.addi %0, %c0_i32_18 : i32
      %33 = arith.index_cast %arg1 : i32 to index
      %34 = arith.index_cast %32 : i32 to index
      %35 = memref.load %arg2[%33, %34] : memref<2x16xi32, #tpu.memory_space<smem>>
      %c0_i32_19 = arith.constant 0 : i32
      %36 = tpu.memref_slice %arg3[%35, %c0_i32_19] : memref<512x128xf32, #tpu.memory_space<any>> -> memref<1x128xf32, #tpu.memory_space<any>>
      %c0_i32_20 = arith.constant 0 : i32
      %c0_i32_21 = arith.constant 0 : i32
      %37 = tpu.memref_slice %arg6[%10, %c0_i32_20, %c0_i32_21] : memref<2x16x128xf32, #tpu.memory_space<vmem>> -> memref<1x1x128xf32, #tpu.memory_space<vmem>>
      %38 = tpu.memref_squeeze %37 : memref<1x1x128xf32, #tpu.memory_space<vmem>> -> memref<1x128xf32, #tpu.memory_space<vmem>>
      %39 = tpu.memref_slice %arg7[%10] : memref<2x!tpu.dma_semaphore, #tpu.memory_space<semaphore_mem>> -> memref<1x!tpu.dma_semaphore, #tpu.memory_space<semaphore_mem>>
      %40 = tpu.memref_squeeze %39 : memref<1x!tpu.dma_semaphore, #tpu.memory_space<semaphore_mem>> -> memref<!tpu.dma_semaphore, #tpu.memory_space<semaphore_mem>>
      tpu.enqueue_dma source(%36 : memref<1x128xf32, #tpu.memory_space<any>>) target(%38 : memref<1x128xf32, #tpu.memory_space<vmem>>) target_semaphore(%40 : memref<!tpu.dma_semaphore, #tpu.memory_space<semaphore_mem>>)
      %c1_i32_22 = arith.constant 1 : i32
      %41 = arith.addi %0, %c1_i32_22 : i32
      %42 = arith.index_cast %arg1 : i32 to index
      %43 = arith.index_cast %41 : i32 to index
      %44 = memref.load %arg2[%42, %43] : memref<2x16xi32, #tpu.memory_space<smem>>
      %c0_i32_23 = arith.constant 0 : i32
      %45 = tpu.memref_slice %arg3[%44, %c0_i32_23] : memref<512x128xf32, #tpu.memory_space<any>> -> memref<1x128xf32, #tpu.memory_space<any>>
      %c1_i32_24 = arith.constant 1 : i32
      %c0_i32_25 = arith.constant 0 : i32
      %46 = tpu.memref_slice %arg6[%10, %c1_i32_24, %c0_i32_25] : memref<2x16x128xf32, #tpu.memory_space<vmem>> -> memref<1x1x128xf32, #tpu.memory_space<vmem>>
      %47 = tpu.memref_squeeze %46 : memref<1x1x128xf32, #tpu.memory_space<vmem>> -> memref<1x128xf32, #tpu.memory_space<vmem>>
      %48 = tpu.memref_slice %arg7[%10] : memref<2x!tpu.dma_semaphore, #tpu.memory_space<semaphore_mem>> -> memref<1x!tpu.dma_semaphore, #tpu.memory_space<semaphore_mem>>
      %49 = tpu.memref_squeeze %48 : memref<1x!tpu.dma_semaphore, #tpu.memory_space<semaphore_mem>> -> memref<!tpu.dma_semaphore, #tpu.memory_space<semaphore_mem>>
      tpu.enqueue_dma source(%45 : memref<1x128xf32, #tpu.memory_space<any>>) target(%47 : memref<1x128xf32, #tpu.memory_space<vmem>>) target_semaphore(%49 : memref<!tpu.dma_semaphore, #tpu.memory_space<semaphore_mem>>)
      %c2_i32_26 = arith.constant 2 : i32
      %50 = arith.addi %0, %c2_i32_26 : i32
      %51 = arith.index_cast %arg1 : i32 to index
      %52 = arith.index_cast %50 : i32 to index
      %53 = memref.load %arg2[%51, %52] : memref<2x16xi32, #tpu.memory_space<smem>>
      %c0_i32_27 = arith.constant 0 : i32
      %54 = tpu.memref_slice %arg3[%53, %c0_i32_27] : memref<512x128xf32, #tpu.memory_space<any>> -> memref<1x128xf32, #tpu.memory_space<any>>
      %c2_i32_28 = arith.constant 2 : i32
      %c0_i32_29 = arith.constant 0 : i32
      %55 = tpu.memref_slice %arg6[%10, %c2_i32_28, %c0_i32_29] : memref<2x16x128xf32, #tpu.memory_space<vmem>> -> memref<1x1x128xf32, #tpu.memory_space<vmem>>
      %56 = tpu.memref_squeeze %55 : memref<1x1x128xf32, #tpu.memory_space<vmem>> -> memref<1x128xf32, #tpu.memory_space<vmem>>
      %57 = tpu.memref_slice %arg7[%10] : memref<2x!tpu.dma_semaphore, #tpu.memory_space<semaphore_mem>> -> memref<1x!tpu.dma_semaphore, #tpu.memory_space<semaphore_mem>>
      %58 = tpu.memref_squeeze %57 : memref<1x!tpu.dma_semaphore, #tpu.memory_space<semaphore_mem>> -> memref<!tpu.dma_semaphore, #tpu.memory_space<semaphore_mem>>
      tpu.enqueue_dma source(%54 : memref<1x128xf32, #tpu.memory_space<any>>) target(%56 : memref<1x128xf32, #tpu.memory_space<vmem>>) target_semaphore(%58 : memref<!tpu.dma_semaphore, #tpu.memory_space<semaphore_mem>>)
      %c3_i32 = arith.constant 3 : i32
      %59 = arith.addi %0, %c3_i32 : i32
      %60 = arith.index_cast %arg1 : i32 to index
      %61 = arith.index_cast %59 : i32 to index
      %62 = memref.load %arg2[%60, %61] : memref<2x16xi32, #tpu.memory_space<smem>>
      %c0_i32_30 = arith.constant 0 : i32
      %63 = tpu.memref_slice %arg3[%62, %c0_i32_30] : memref<512x128xf32, #tpu.memory_space<any>> -> memref<1x128xf32, #tpu.memory_space<any>>
      %c3_i32_31 = arith.constant 3 : i32
      %c0_i32_32 = arith.constant 0 : i32
      %64 = tpu.memref_slice %arg6[%10, %c3_i32_31, %c0_i32_32] : memref<2x16x128xf32, #tpu.memory_space<vmem>> -> memref<1x1x128xf32, #tpu.memory_space<vmem>>
      %65 = tpu.memref_squeeze %64 : memref<1x1x128xf32, #tpu.memory_space<vmem>> -> memref<1x128xf32, #tpu.memory_space<vmem>>
      %66 = tpu.memref_slice %arg7[%10] : memref<2x!tpu.dma_semaphore, #tpu.memory_space<semaphore_mem>> -> memref<1x!tpu.dma_semaphore, #tpu.memory_space<semaphore_mem>>
      %67 = tpu.memref_squeeze %66 : memref<1x!tpu.dma_semaphore, #tpu.memory_space<semaphore_mem>> -> memref<!tpu.dma_semaphore, #tpu.memory_space<semaphore_mem>>
      tpu.enqueue_dma source(%63 : memref<1x128xf32, #tpu.memory_space<any>>) target(%65 : memref<1x128xf32, #tpu.memory_space<vmem>>) target_semaphore(%67 : memref<!tpu.dma_semaphore, #tpu.memory_space<semaphore_mem>>)
      %c4_i32 = arith.constant 4 : i32
      %68 = arith.addi %0, %c4_i32 : i32
      %69 = arith.index_cast %arg1 : i32 to index
      %70 = arith.index_cast %68 : i32 to index
      %71 = memref.load %arg2[%69, %70] : memref<2x16xi32, #tpu.memory_space<smem>>
      %c0_i32_33 = arith.constant 0 : i32
      %72 = tpu.memref_slice %arg3[%71, %c0_i32_33] : memref<512x128xf32, #tpu.memory_space<any>> -> memref<1x128xf32, #tpu.memory_space<any>>
      %c4_i32_34 = arith.constant 4 : i32
      %c0_i32_35 = arith.constant 0 : i32
      %73 = tpu.memref_slice %arg6[%10, %c4_i32_34, %c0_i32_35] : memref<2x16x128xf32, #tpu.memory_space<vmem>> -> memref<1x1x128xf32, #tpu.memory_space<vmem>>
      %74 = tpu.memref_squeeze %73 : memref<1x1x128xf32, #tpu.memory_space<vmem>> -> memref<1x128xf32, #tpu.memory_space<vmem>>
      %75 = tpu.memref_slice %arg7[%10] : memref<2x!tpu.dma_semaphore, #tpu.memory_space<semaphore_mem>> -> memref<1x!tpu.dma_semaphore, #tpu.memory_space<semaphore_mem>>
      %76 = tpu.memref_squeeze %75 : memref<1x!tpu.dma_semaphore, #tpu.memory_space<semaphore_mem>> -> memref<!tpu.dma_semaphore, #tpu.memory_space<semaphore_mem>>
      tpu.enqueue_dma source(%72 : memref<1x128xf32, #tpu.memory_space<any>>) target(%74 : memref<1x128xf32, #tpu.memory_space<vmem>>) target_semaphore(%76 : memref<!tpu.dma_semaphore, #tpu.memory_space<semaphore_mem>>)
      %c5_i32 = arith.constant 5 : i32
      %77 = arith.addi %0, %c5_i32 : i32
      %78 = arith.index_cast %arg1 : i32 to index
      %79 = arith.index_cast %77 : i32 to index
      %80 = memref.load %arg2[%78, %79] : memref<2x16xi32, #tpu.memory_space<smem>>
      %c0_i32_36 = arith.constant 0 : i32
      %81 = tpu.memref_slice %arg3[%80, %c0_i32_36] : memref<512x128xf32, #tpu.memory_space<any>> -> memref<1x128xf32, #tpu.memory_space<any>>
      %c5_i32_37 = arith.constant 5 : i32
      %c0_i32_38 = arith.constant 0 : i32
      %82 = tpu.memref_slice %arg6[%10, %c5_i32_37, %c0_i32_38] : memref<2x16x128xf32, #tpu.memory_space<vmem>> -> memref<1x1x128xf32, #tpu.memory_space<vmem>>
      %83 = tpu.memref_squeeze %82 : memref<1x1x128xf32, #tpu.memory_space<vmem>> -> memref<1x128xf32, #tpu.memory_space<vmem>>
      %84 = tpu.memref_slice %arg7[%10] : memref<2x!tpu.dma_semaphore, #tpu.memory_space<semaphore_mem>> -> memref<1x!tpu.dma_semaphore, #tpu.memory_space<semaphore_mem>>
      %85 = tpu.memref_squeeze %84 : memref<1x!tpu.dma_semaphore, #tpu.memory_space<semaphore_mem>> -> memref<!tpu.dma_semaphore, #tpu.memory_space<semaphore_mem>>
      tpu.enqueue_dma source(%81 : memref<1x128xf32, #tpu.memory_space<any>>) target(%83 : memref<1x128xf32, #tpu.memory_space<vmem>>) target_semaphore(%85 : memref<!tpu.dma_semaphore, #tpu.memory_space<semaphore_mem>>)
      %c6_i32 = arith.constant 6 : i32
      %86 = arith.addi %0, %c6_i32 : i32
      %87 = arith.index_cast %arg1 : i32 to index
      %88 = arith.index_cast %86 : i32 to index
      %89 = memref.load %arg2[%87, %88] : memref<2x16xi32, #tpu.memory_space<smem>>
      %c0_i32_39 = arith.constant 0 : i32
      %90 = tpu.memref_slice %arg3[%89, %c0_i32_39] : memref<512x128xf32, #tpu.memory_space<any>> -> memref<1x128xf32, #tpu.memory_space<any>>
      %c6_i32_40 = arith.constant 6 : i32
      %c0_i32_41 = arith.constant 0 : i32
      %91 = tpu.memref_slice %arg6[%10, %c6_i32_40, %c0_i32_41] : memref<2x16x128xf32, #tpu.memory_space<vmem>> -> memref<1x1x128xf32, #tpu.memory_space<vmem>>
      %92 = tpu.memref_squeeze %91 : memref<1x1x128xf32, #tpu.memory_space<vmem>> -> memref<1x128xf32, #tpu.memory_space<vmem>>
      %93 = tpu.memref_slice %arg7[%10] : memref<2x!tpu.dma_semaphore, #tpu.memory_space<semaphore_mem>> -> memref<1x!tpu.dma_semaphore, #tpu.memory_space<semaphore_mem>>
      %94 = tpu.memref_squeeze %93 : memref<1x!tpu.dma_semaphore, #tpu.memory_space<semaphore_mem>> -> memref<!tpu.dma_semaphore, #tpu.memory_space<semaphore_mem>>
      tpu.enqueue_dma source(%90 : memref<1x128xf32, #tpu.memory_space<any>>) target(%92 : memref<1x128xf32, #tpu.memory_space<vmem>>) target_semaphore(%94 : memref<!tpu.dma_semaphore, #tpu.memory_space<semaphore_mem>>)
      %c7_i32 = arith.constant 7 : i32
      %95 = arith.addi %0, %c7_i32 : i32
      %96 = arith.index_cast %arg1 : i32 to index
      %97 = arith.index_cast %95 : i32 to index
      %98 = memref.load %arg2[%96, %97] : memref<2x16xi32, #tpu.memory_space<smem>>
      %c0_i32_42 = arith.constant 0 : i32
      %99 = tpu.memref_slice %arg3[%98, %c0_i32_42] : memref<512x128xf32, #tpu.memory_space<any>> -> memref<1x128xf32, #tpu.memory_space<any>>
      %c7_i32_43 = arith.constant 7 : i32
      %c0_i32_44 = arith.constant 0 : i32
      %100 = tpu.memref_slice %arg6[%10, %c7_i32_43, %c0_i32_44] : memref<2x16x128xf32, #tpu.memory_space<vmem>> -> memref<1x1x128xf32, #tpu.memory_space<vmem>>
      %101 = tpu.memref_squeeze %100 : memref<1x1x128xf32, #tpu.memory_space<vmem>> -> memref<1x128xf32, #tpu.memory_space<vmem>>
      %102 = tpu.memref_slice %arg7[%10] : memref<2x!tpu.dma_semaphore, #tpu.memory_space<semaphore_mem>> -> memref<1x!tpu.dma_semaphore, #tpu.memory_space<semaphore_mem>>
      %103 = tpu.memref_squeeze %102 : memref<1x!tpu.dma_semaphore, #tpu.memory_space<semaphore_mem>> -> memref<!tpu.dma_semaphore, #tpu.memory_space<semaphore_mem>>
      tpu.enqueue_dma source(%99 : memref<1x128xf32, #tpu.memory_space<any>>) target(%101 : memref<1x128xf32, #tpu.memory_space<vmem>>) target_semaphore(%103 : memref<!tpu.dma_semaphore, #tpu.memory_space<semaphore_mem>>)
      %c8_i32 = arith.constant 8 : i32
      %104 = arith.addi %0, %c8_i32 : i32
      %105 = arith.index_cast %arg1 : i32 to index
      %106 = arith.index_cast %104 : i32 to index
      %107 = memref.load %arg2[%105, %106] : memref<2x16xi32, #tpu.memory_space<smem>>
      %c0_i32_45 = arith.constant 0 : i32
      %108 = tpu.memref_slice %arg3[%107, %c0_i32_45] : memref<512x128xf32, #tpu.memory_space<any>> -> memref<1x128xf32, #tpu.memory_space<any>>
      %c8_i32_46 = arith.constant 8 : i32
      %c0_i32_47 = arith.constant 0 : i32
      %109 = tpu.memref_slice %arg6[%10, %c8_i32_46, %c0_i32_47] : memref<2x16x128xf32, #tpu.memory_space<vmem>> -> memref<1x1x128xf32, #tpu.memory_space<vmem>>
      %110 = tpu.memref_squeeze %109 : memref<1x1x128xf32, #tpu.memory_space<vmem>> -> memref<1x128xf32, #tpu.memory_space<vmem>>
      %111 = tpu.memref_slice %arg7[%10] : memref<2x!tpu.dma_semaphore, #tpu.memory_space<semaphore_mem>> -> memref<1x!tpu.dma_semaphore, #tpu.memory_space<semaphore_mem>>
      %112 = tpu.memref_squeeze %111 : memref<1x!tpu.dma_semaphore, #tpu.memory_space<semaphore_mem>> -> memref<!tpu.dma_semaphore, #tpu.memory_space<semaphore_mem>>
      tpu.enqueue_dma source(%108 : memref<1x128xf32, #tpu.memory_space<any>>) target(%110 : memref<1x128xf32, #tpu.memory_space<vmem>>) target_semaphore(%112 : memref<!tpu.dma_semaphore, #tpu.memory_space<semaphore_mem>>)
      %c9_i32 = arith.constant 9 : i32
      %113 = arith.addi %0, %c9_i32 : i32
      %114 = arith.index_cast %arg1 : i32 to index
      %115 = arith.index_cast %113 : i32 to index
      %116 = memref.load %arg2[%114, %115] : memref<2x16xi32, #tpu.memory_space<smem>>
      %c0_i32_48 = arith.constant 0 : i32
      %117 = tpu.memref_slice %arg3[%116, %c0_i32_48] : memref<512x128xf32, #tpu.memory_space<any>> -> memref<1x128xf32, #tpu.memory_space<any>>
      %c9_i32_49 = arith.constant 9 : i32
      %c0_i32_50 = arith.constant 0 : i32
      %118 = tpu.memref_slice %arg6[%10, %c9_i32_49, %c0_i32_50] : memref<2x16x128xf32, #tpu.memory_space<vmem>> -> memref<1x1x128xf32, #tpu.memory_space<vmem>>
      %119 = tpu.memref_squeeze %118 : memref<1x1x128xf32, #tpu.memory_space<vmem>> -> memref<1x128xf32, #tpu.memory_space<vmem>>
      %120 = tpu.memref_slice %arg7[%10] : memref<2x!tpu.dma_semaphore, #tpu.memory_space<semaphore_mem>> -> memref<1x!tpu.dma_semaphore, #tpu.memory_space<semaphore_mem>>
      %121 = tpu.memref_squeeze %120 : memref<1x!tpu.dma_semaphore, #tpu.memory_space<semaphore_mem>> -> memref<!tpu.dma_semaphore, #tpu.memory_space<semaphore_mem>>
      tpu.enqueue_dma source(%117 : memref<1x128xf32, #tpu.memory_space<any>>) target(%119 : memref<1x128xf32, #tpu.memory_space<vmem>>) target_semaphore(%121 : memref<!tpu.dma_semaphore, #tpu.memory_space<semaphore_mem>>)
      %c10_i32 = arith.constant 10 : i32
      %122 = arith.addi %0, %c10_i32 : i32
      %123 = arith.index_cast %arg1 : i32 to index
      %124 = arith.index_cast %122 : i32 to index
      %125 = memref.load %arg2[%123, %124] : memref<2x16xi32, #tpu.memory_space<smem>>
      %c0_i32_51 = arith.constant 0 : i32
      %126 = tpu.memref_slice %arg3[%125, %c0_i32_51] : memref<512x128xf32, #tpu.memory_space<any>> -> memref<1x128xf32, #tpu.memory_space<any>>
      %c10_i32_52 = arith.constant 10 : i32
      %c0_i32_53 = arith.constant 0 : i32
      %127 = tpu.memref_slice %arg6[%10, %c10_i32_52, %c0_i32_53] : memref<2x16x128xf32, #tpu.memory_space<vmem>> -> memref<1x1x128xf32, #tpu.memory_space<vmem>>
      %128 = tpu.memref_squeeze %127 : memref<1x1x128xf32, #tpu.memory_space<vmem>> -> memref<1x128xf32, #tpu.memory_space<vmem>>
      %129 = tpu.memref_slice %arg7[%10] : memref<2x!tpu.dma_semaphore, #tpu.memory_space<semaphore_mem>> -> memref<1x!tpu.dma_semaphore, #tpu.memory_space<semaphore_mem>>
      %130 = tpu.memref_squeeze %129 : memref<1x!tpu.dma_semaphore, #tpu.memory_space<semaphore_mem>> -> memref<!tpu.dma_semaphore, #tpu.memory_space<semaphore_mem>>
      tpu.enqueue_dma source(%126 : memref<1x128xf32, #tpu.memory_space<any>>) target(%128 : memref<1x128xf32, #tpu.memory_space<vmem>>) target_semaphore(%130 : memref<!tpu.dma_semaphore, #tpu.memory_space<semaphore_mem>>)
      %c11_i32 = arith.constant 11 : i32
      %131 = arith.addi %0, %c11_i32 : i32
      %132 = arith.index_cast %arg1 : i32 to index
      %133 = arith.index_cast %131 : i32 to index
      %134 = memref.load %arg2[%132, %133] : memref<2x16xi32, #tpu.memory_space<smem>>
      %c0_i32_54 = arith.constant 0 : i32
      %135 = tpu.memref_slice %arg3[%134, %c0_i32_54] : memref<512x128xf32, #tpu.memory_space<any>> -> memref<1x128xf32, #tpu.memory_space<any>>
      %c11_i32_55 = arith.constant 11 : i32
      %c0_i32_56 = arith.constant 0 : i32
      %136 = tpu.memref_slice %arg6[%10, %c11_i32_55, %c0_i32_56] : memref<2x16x128xf32, #tpu.memory_space<vmem>> -> memref<1x1x128xf32, #tpu.memory_space<vmem>>
      %137 = tpu.memref_squeeze %136 : memref<1x1x128xf32, #tpu.memory_space<vmem>> -> memref<1x128xf32, #tpu.memory_space<vmem>>
      %138 = tpu.memref_slice %arg7[%10] : memref<2x!tpu.dma_semaphore, #tpu.memory_space<semaphore_mem>> -> memref<1x!tpu.dma_semaphore, #tpu.memory_space<semaphore_mem>>
      %139 = tpu.memref_squeeze %138 : memref<1x!tpu.dma_semaphore, #tpu.memory_space<semaphore_mem>> -> memref<!tpu.dma_semaphore, #tpu.memory_space<semaphore_mem>>
      tpu.enqueue_dma source(%135 : memref<1x128xf32, #tpu.memory_space<any>>) target(%137 : memref<1x128xf32, #tpu.memory_space<vmem>>) target_semaphore(%139 : memref<!tpu.dma_semaphore, #tpu.memory_space<semaphore_mem>>)
      %c12_i32 = arith.constant 12 : i32
      %140 = arith.addi %0, %c12_i32 : i32
      %141 = arith.index_cast %arg1 : i32 to index
      %142 = arith.index_cast %140 : i32 to index
      %143 = memref.load %arg2[%141, %142] : memref<2x16xi32, #tpu.memory_space<smem>>
      %c0_i32_57 = arith.constant 0 : i32
      %144 = tpu.memref_slice %arg3[%143, %c0_i32_57] : memref<512x128xf32, #tpu.memory_space<any>> -> memref<1x128xf32, #tpu.memory_space<any>>
      %c12_i32_58 = arith.constant 12 : i32
      %c0_i32_59 = arith.constant 0 : i32
      %145 = tpu.memref_slice %arg6[%10, %c12_i32_58, %c0_i32_59] : memref<2x16x128xf32, #tpu.memory_space<vmem>> -> memref<1x1x128xf32, #tpu.memory_space<vmem>>
      %146 = tpu.memref_squeeze %145 : memref<1x1x128xf32, #tpu.memory_space<vmem>> -> memref<1x128xf32, #tpu.memory_space<vmem>>
      %147 = tpu.memref_slice %arg7[%10] : memref<2x!tpu.dma_semaphore, #tpu.memory_space<semaphore_mem>> -> memref<1x!tpu.dma_semaphore, #tpu.memory_space<semaphore_mem>>
      %148 = tpu.memref_squeeze %147 : memref<1x!tpu.dma_semaphore, #tpu.memory_space<semaphore_mem>> -> memref<!tpu.dma_semaphore, #tpu.memory_space<semaphore_mem>>
      tpu.enqueue_dma source(%144 : memref<1x128xf32, #tpu.memory_space<any>>) target(%146 : memref<1x128xf32, #tpu.memory_space<vmem>>) target_semaphore(%148 : memref<!tpu.dma_semaphore, #tpu.memory_space<semaphore_mem>>)
      %c13_i32 = arith.constant 13 : i32
      %149 = arith.addi %0, %c13_i32 : i32
      %150 = arith.index_cast %arg1 : i32 to index
      %151 = arith.index_cast %149 : i32 to index
      %152 = memref.load %arg2[%150, %151] : memref<2x16xi32, #tpu.memory_space<smem>>
      %c0_i32_60 = arith.constant 0 : i32
      %153 = tpu.memref_slice %arg3[%152, %c0_i32_60] : memref<512x128xf32, #tpu.memory_space<any>> -> memref<1x128xf32, #tpu.memory_space<any>>
      %c13_i32_61 = arith.constant 13 : i32
      %c0_i32_62 = arith.constant 0 : i32
      %154 = tpu.memref_slice %arg6[%10, %c13_i32_61, %c0_i32_62] : memref<2x16x128xf32, #tpu.memory_space<vmem>> -> memref<1x1x128xf32, #tpu.memory_space<vmem>>
      %155 = tpu.memref_squeeze %154 : memref<1x1x128xf32, #tpu.memory_space<vmem>> -> memref<1x128xf32, #tpu.memory_space<vmem>>
      %156 = tpu.memref_slice %arg7[%10] : memref<2x!tpu.dma_semaphore, #tpu.memory_space<semaphore_mem>> -> memref<1x!tpu.dma_semaphore, #tpu.memory_space<semaphore_mem>>
      %157 = tpu.memref_squeeze %156 : memref<1x!tpu.dma_semaphore, #tpu.memory_space<semaphore_mem>> -> memref<!tpu.dma_semaphore, #tpu.memory_space<semaphore_mem>>
      tpu.enqueue_dma source(%153 : memref<1x128xf32, #tpu.memory_space<any>>) target(%155 : memref<1x128xf32, #tpu.memory_space<vmem>>) target_semaphore(%157 : memref<!tpu.dma_semaphore, #tpu.memory_space<semaphore_mem>>)
      %c14_i32 = arith.constant 14 : i32
      %158 = arith.addi %0, %c14_i32 : i32
      %159 = arith.index_cast %arg1 : i32 to index
      %160 = arith.index_cast %158 : i32 to index
      %161 = memref.load %arg2[%159, %160] : memref<2x16xi32, #tpu.memory_space<smem>>
      %c0_i32_63 = arith.constant 0 : i32
      %162 = tpu.memref_slice %arg3[%161, %c0_i32_63] : memref<512x128xf32, #tpu.memory_space<any>> -> memref<1x128xf32, #tpu.memory_space<any>>
      %c14_i32_64 = arith.constant 14 : i32
      %c0_i32_65 = arith.constant 0 : i32
      %163 = tpu.memref_slice %arg6[%10, %c14_i32_64, %c0_i32_65] : memref<2x16x128xf32, #tpu.memory_space<vmem>> -> memref<1x1x128xf32, #tpu.memory_space<vmem>>
      %164 = tpu.memref_squeeze %163 : memref<1x1x128xf32, #tpu.memory_space<vmem>> -> memref<1x128xf32, #tpu.memory_space<vmem>>
      %165 = tpu.memref_slice %arg7[%10] : memref<2x!tpu.dma_semaphore, #tpu.memory_space<semaphore_mem>> -> memref<1x!tpu.dma_semaphore, #tpu.memory_space<semaphore_mem>>
      %166 = tpu.memref_squeeze %165 : memref<1x!tpu.dma_semaphore, #tpu.memory_space<semaphore_mem>> -> memref<!tpu.dma_semaphore, #tpu.memory_space<semaphore_mem>>
      tpu.enqueue_dma source(%162 : memref<1x128xf32, #tpu.memory_space<any>>) target(%164 : memref<1x128xf32, #tpu.memory_space<vmem>>) target_semaphore(%166 : memref<!tpu.dma_semaphore, #tpu.memory_space<semaphore_mem>>)
      %c15_i32 = arith.constant 15 : i32
      %167 = arith.addi %0, %c15_i32 : i32
      %168 = arith.index_cast %arg1 : i32 to index
      %169 = arith.index_cast %167 : i32 to index
      %170 = memref.load %arg2[%168, %169] : memref<2x16xi32, #tpu.memory_space<smem>>
      %c0_i32_66 = arith.constant 0 : i32
      %171 = tpu.memref_slice %arg3[%170, %c0_i32_66] : memref<512x128xf32, #tpu.memory_space<any>> -> memref<1x128xf32, #tpu.memory_space<any>>
      %c15_i32_67 = arith.constant 15 : i32
      %c0_i32_68 = arith.constant 0 : i32
      %172 = tpu.memref_slice %arg6[%10, %c15_i32_67, %c0_i32_68] : memref<2x16x128xf32, #tpu.memory_space<vmem>> -> memref<1x1x128xf32, #tpu.memory_space<vmem>>
      %173 = tpu.memref_squeeze %172 : memref<1x1x128xf32, #tpu.memory_space<vmem>> -> memref<1x128xf32, #tpu.memory_space<vmem>>
      %174 = tpu.memref_slice %arg7[%10] : memref<2x!tpu.dma_semaphore, #tpu.memory_space<semaphore_mem>> -> memref<1x!tpu.dma_semaphore, #tpu.memory_space<semaphore_mem>>
      %175 = tpu.memref_squeeze %174 : memref<1x!tpu.dma_semaphore, #tpu.memory_space<semaphore_mem>> -> memref<!tpu.dma_semaphore, #tpu.memory_space<semaphore_mem>>
      tpu.enqueue_dma source(%171 : memref<1x128xf32, #tpu.memory_space<any>>) target(%173 : memref<1x128xf32, #tpu.memory_space<vmem>>) target_semaphore(%175 : memref<!tpu.dma_semaphore, #tpu.memory_space<semaphore_mem>>)
    } else {
    }
    %c1_i32_5 = arith.constant 1 : i32
    %14 = arith.addi %arg1, %c1_i32_5 : i32
    %c2_i32_6 = arith.constant 2 : i32
    %15 = arith.cmpi slt, %14, %c2_i32_6 : i32
    %16 = arith.extui %15 : i1 to i32
    %c0_i32_7 = arith.constant 0 : i32
    %17 = arith.cmpi ne, %16, %c0_i32_7 : i32
    scf.if %17 {
      %c1_i32_18 = arith.constant 1 : i32
      %32 = arith.addi %arg1, %c1_i32_18 : i32
      %c1_i32_19 = arith.constant 1 : i32
      %33 = arith.subi %c1_i32_19, %10 : i32
      %c0_i32_20 = arith.constant 0 : i32
      %34 = arith.addi %0, %c0_i32_20 : i32
      %35 = arith.index_cast %32 : i32 to index
      %36 = arith.index_cast %34 : i32 to index
      %37 = memref.load %arg2[%35, %36] : memref<2x16xi32, #tpu.memory_space<smem>>
      %c0_i32_21 = arith.constant 0 : i32
      %38 = tpu.memref_slice %arg3[%37, %c0_i32_21] : memref<512x128xf32, #tpu.memory_space<any>> -> memref<1x128xf32, #tpu.memory_space<any>>
      %c0_i32_22 = arith.constant 0 : i32
      %c0_i32_23 = arith.constant 0 : i32
      %39 = tpu.memref_slice %arg6[%33, %c0_i32_22, %c0_i32_23] : memref<2x16x128xf32, #tpu.memory_space<vmem>> -> memref<1x1x128xf32, #tpu.memory_space<vmem>>
      %40 = tpu.memref_squeeze %39 : memref<1x1x128xf32, #tpu.memory_space<vmem>> -> memref<1x128xf32, #tpu.memory_space<vmem>>
      %41 = tpu.memref_slice %arg7[%33] : memref<2x!tpu.dma_semaphore, #tpu.memory_space<semaphore_mem>> -> memref<1x!tpu.dma_semaphore, #tpu.memory_space<semaphore_mem>>
      %42 = tpu.memref_squeeze %41 : memref<1x!tpu.dma_semaphore, #tpu.memory_space<semaphore_mem>> -> memref<!tpu.dma_semaphore, #tpu.memory_space<semaphore_mem>>
      tpu.enqueue_dma source(%38 : memref<1x128xf32, #tpu.memory_space<any>>) target(%40 : memref<1x128xf32, #tpu.memory_space<vmem>>) target_semaphore(%42 : memref<!tpu.dma_semaphore, #tpu.memory_space<semaphore_mem>>)
      %c1_i32_24 = arith.constant 1 : i32
      %43 = arith.addi %0, %c1_i32_24 : i32
      %44 = arith.index_cast %32 : i32 to index
      %45 = arith.index_cast %43 : i32 to index
      %46 = memref.load %arg2[%44, %45] : memref<2x16xi32, #tpu.memory_space<smem>>
      %c0_i32_25 = arith.constant 0 : i32
      %47 = tpu.memref_slice %arg3[%46, %c0_i32_25] : memref<512x128xf32, #tpu.memory_space<any>> -> memref<1x128xf32, #tpu.memory_space<any>>
      %c1_i32_26 = arith.constant 1 : i32
      %c0_i32_27 = arith.constant 0 : i32
      %48 = tpu.memref_slice %arg6[%33, %c1_i32_26, %c0_i32_27] : memref<2x16x128xf32, #tpu.memory_space<vmem>> -> memref<1x1x128xf32, #tpu.memory_space<vmem>>
      %49 = tpu.memref_squeeze %48 : memref<1x1x128xf32, #tpu.memory_space<vmem>> -> memref<1x128xf32, #tpu.memory_space<vmem>>
      %50 = tpu.memref_slice %arg7[%33] : memref<2x!tpu.dma_semaphore, #tpu.memory_space<semaphore_mem>> -> memref<1x!tpu.dma_semaphore, #tpu.memory_space<semaphore_mem>>
      %51 = tpu.memref_squeeze %50 : memref<1x!tpu.dma_semaphore, #tpu.memory_space<semaphore_mem>> -> memref<!tpu.dma_semaphore, #tpu.memory_space<semaphore_mem>>
      tpu.enqueue_dma source(%47 : memref<1x128xf32, #tpu.memory_space<any>>) target(%49 : memref<1x128xf32, #tpu.memory_space<vmem>>) target_semaphore(%51 : memref<!tpu.dma_semaphore, #tpu.memory_space<semaphore_mem>>)
      %c2_i32_28 = arith.constant 2 : i32
      %52 = arith.addi %0, %c2_i32_28 : i32
      %53 = arith.index_cast %32 : i32 to index
      %54 = arith.index_cast %52 : i32 to index
      %55 = memref.load %arg2[%53, %54] : memref<2x16xi32, #tpu.memory_space<smem>>
      %c0_i32_29 = arith.constant 0 : i32
      %56 = tpu.memref_slice %arg3[%55, %c0_i32_29] : memref<512x128xf32, #tpu.memory_space<any>> -> memref<1x128xf32, #tpu.memory_space<any>>
      %c2_i32_30 = arith.constant 2 : i32
      %c0_i32_31 = arith.constant 0 : i32
      %57 = tpu.memref_slice %arg6[%33, %c2_i32_30, %c0_i32_31] : memref<2x16x128xf32, #tpu.memory_space<vmem>> -> memref<1x1x128xf32, #tpu.memory_space<vmem>>
      %58 = tpu.memref_squeeze %57 : memref<1x1x128xf32, #tpu.memory_space<vmem>> -> memref<1x128xf32, #tpu.memory_space<vmem>>
      %59 = tpu.memref_slice %arg7[%33] : memref<2x!tpu.dma_semaphore, #tpu.memory_space<semaphore_mem>> -> memref<1x!tpu.dma_semaphore, #tpu.memory_space<semaphore_mem>>
      %60 = tpu.memref_squeeze %59 : memref<1x!tpu.dma_semaphore, #tpu.memory_space<semaphore_mem>> -> memref<!tpu.dma_semaphore, #tpu.memory_space<semaphore_mem>>
      tpu.enqueue_dma source(%56 : memref<1x128xf32, #tpu.memory_space<any>>) target(%58 : memref<1x128xf32, #tpu.memory_space<vmem>>) target_semaphore(%60 : memref<!tpu.dma_semaphore, #tpu.memory_space<semaphore_mem>>)
      %c3_i32 = arith.constant 3 : i32
      %61 = arith.addi %0, %c3_i32 : i32
      %62 = arith.index_cast %32 : i32 to index
      %63 = arith.index_cast %61 : i32 to index
      %64 = memref.load %arg2[%62, %63] : memref<2x16xi32, #tpu.memory_space<smem>>
      %c0_i32_32 = arith.constant 0 : i32
      %65 = tpu.memref_slice %arg3[%64, %c0_i32_32] : memref<512x128xf32, #tpu.memory_space<any>> -> memref<1x128xf32, #tpu.memory_space<any>>
      %c3_i32_33 = arith.constant 3 : i32
      %c0_i32_34 = arith.constant 0 : i32
      %66 = tpu.memref_slice %arg6[%33, %c3_i32_33, %c0_i32_34] : memref<2x16x128xf32, #tpu.memory_space<vmem>> -> memref<1x1x128xf32, #tpu.memory_space<vmem>>
      %67 = tpu.memref_squeeze %66 : memref<1x1x128xf32, #tpu.memory_space<vmem>> -> memref<1x128xf32, #tpu.memory_space<vmem>>
      %68 = tpu.memref_slice %arg7[%33] : memref<2x!tpu.dma_semaphore, #tpu.memory_space<semaphore_mem>> -> memref<1x!tpu.dma_semaphore, #tpu.memory_space<semaphore_mem>>
      %69 = tpu.memref_squeeze %68 : memref<1x!tpu.dma_semaphore, #tpu.memory_space<semaphore_mem>> -> memref<!tpu.dma_semaphore, #tpu.memory_space<semaphore_mem>>
      tpu.enqueue_dma source(%65 : memref<1x128xf32, #tpu.memory_space<any>>) target(%67 : memref<1x128xf32, #tpu.memory_space<vmem>>) target_semaphore(%69 : memref<!tpu.dma_semaphore, #tpu.memory_space<semaphore_mem>>)
      %c4_i32 = arith.constant 4 : i32
      %70 = arith.addi %0, %c4_i32 : i32
      %71 = arith.index_cast %32 : i32 to index
      %72 = arith.index_cast %70 : i32 to index
      %73 = memref.load %arg2[%71, %72] : memref<2x16xi32, #tpu.memory_space<smem>>
      %c0_i32_35 = arith.constant 0 : i32
      %74 = tpu.memref_slice %arg3[%73, %c0_i32_35] : memref<512x128xf32, #tpu.memory_space<any>> -> memref<1x128xf32, #tpu.memory_space<any>>
      %c4_i32_36 = arith.constant 4 : i32
      %c0_i32_37 = arith.constant 0 : i32
      %75 = tpu.memref_slice %arg6[%33, %c4_i32_36, %c0_i32_37] : memref<2x16x128xf32, #tpu.memory_space<vmem>> -> memref<1x1x128xf32, #tpu.memory_space<vmem>>
      %76 = tpu.memref_squeeze %75 : memref<1x1x128xf32, #tpu.memory_space<vmem>> -> memref<1x128xf32, #tpu.memory_space<vmem>>
      %77 = tpu.memref_slice %arg7[%33] : memref<2x!tpu.dma_semaphore, #tpu.memory_space<semaphore_mem>> -> memref<1x!tpu.dma_semaphore, #tpu.memory_space<semaphore_mem>>
      %78 = tpu.memref_squeeze %77 : memref<1x!tpu.dma_semaphore, #tpu.memory_space<semaphore_mem>> -> memref<!tpu.dma_semaphore, #tpu.memory_space<semaphore_mem>>
      tpu.enqueue_dma source(%74 : memref<1x128xf32, #tpu.memory_space<any>>) target(%76 : memref<1x128xf32, #tpu.memory_space<vmem>>) target_semaphore(%78 : memref<!tpu.dma_semaphore, #tpu.memory_space<semaphore_mem>>)
      %c5_i32 = arith.constant 5 : i32
      %79 = arith.addi %0, %c5_i32 : i32
      %80 = arith.index_cast %32 : i32 to index
      %81 = arith.index_cast %79 : i32 to index
      %82 = memref.load %arg2[%80, %81] : memref<2x16xi32, #tpu.memory_space<smem>>
      %c0_i32_38 = arith.constant 0 : i32
      %83 = tpu.memref_slice %arg3[%82, %c0_i32_38] : memref<512x128xf32, #tpu.memory_space<any>> -> memref<1x128xf32, #tpu.memory_space<any>>
      %c5_i32_39 = arith.constant 5 : i32
      %c0_i32_40 = arith.constant 0 : i32
      %84 = tpu.memref_slice %arg6[%33, %c5_i32_39, %c0_i32_40] : memref<2x16x128xf32, #tpu.memory_space<vmem>> -> memref<1x1x128xf32, #tpu.memory_space<vmem>>
      %85 = tpu.memref_squeeze %84 : memref<1x1x128xf32, #tpu.memory_space<vmem>> -> memref<1x128xf32, #tpu.memory_space<vmem>>
      %86 = tpu.memref_slice %arg7[%33] : memref<2x!tpu.dma_semaphore, #tpu.memory_space<semaphore_mem>> -> memref<1x!tpu.dma_semaphore, #tpu.memory_space<semaphore_mem>>
      %87 = tpu.memref_squeeze %86 : memref<1x!tpu.dma_semaphore, #tpu.memory_space<semaphore_mem>> -> memref<!tpu.dma_semaphore, #tpu.memory_space<semaphore_mem>>
      tpu.enqueue_dma source(%83 : memref<1x128xf32, #tpu.memory_space<any>>) target(%85 : memref<1x128xf32, #tpu.memory_space<vmem>>) target_semaphore(%87 : memref<!tpu.dma_semaphore, #tpu.memory_space<semaphore_mem>>)
      %c6_i32 = arith.constant 6 : i32
      %88 = arith.addi %0, %c6_i32 : i32
      %89 = arith.index_cast %32 : i32 to index
      %90 = arith.index_cast %88 : i32 to index
      %91 = memref.load %arg2[%89, %90] : memref<2x16xi32, #tpu.memory_space<smem>>
      %c0_i32_41 = arith.constant 0 : i32
      %92 = tpu.memref_slice %arg3[%91, %c0_i32_41] : memref<512x128xf32, #tpu.memory_space<any>> -> memref<1x128xf32, #tpu.memory_space<any>>
      %c6_i32_42 = arith.constant 6 : i32
      %c0_i32_43 = arith.constant 0 : i32
      %93 = tpu.memref_slice %arg6[%33, %c6_i32_42, %c0_i32_43] : memref<2x16x128xf32, #tpu.memory_space<vmem>> -> memref<1x1x128xf32, #tpu.memory_space<vmem>>
      %94 = tpu.memref_squeeze %93 : memref<1x1x128xf32, #tpu.memory_space<vmem>> -> memref<1x128xf32, #tpu.memory_space<vmem>>
      %95 = tpu.memref_slice %arg7[%33] : memref<2x!tpu.dma_semaphore, #tpu.memory_space<semaphore_mem>> -> memref<1x!tpu.dma_semaphore, #tpu.memory_space<semaphore_mem>>
      %96 = tpu.memref_squeeze %95 : memref<1x!tpu.dma_semaphore, #tpu.memory_space<semaphore_mem>> -> memref<!tpu.dma_semaphore, #tpu.memory_space<semaphore_mem>>
      tpu.enqueue_dma source(%92 : memref<1x128xf32, #tpu.memory_space<any>>) target(%94 : memref<1x128xf32, #tpu.memory_space<vmem>>) target_semaphore(%96 : memref<!tpu.dma_semaphore, #tpu.memory_space<semaphore_mem>>)
      %c7_i32 = arith.constant 7 : i32
      %97 = arith.addi %0, %c7_i32 : i32
      %98 = arith.index_cast %32 : i32 to index
      %99 = arith.index_cast %97 : i32 to index
      %100 = memref.load %arg2[%98, %99] : memref<2x16xi32, #tpu.memory_space<smem>>
      %c0_i32_44 = arith.constant 0 : i32
      %101 = tpu.memref_slice %arg3[%100, %c0_i32_44] : memref<512x128xf32, #tpu.memory_space<any>> -> memref<1x128xf32, #tpu.memory_space<any>>
      %c7_i32_45 = arith.constant 7 : i32
      %c0_i32_46 = arith.constant 0 : i32
      %102 = tpu.memref_slice %arg6[%33, %c7_i32_45, %c0_i32_46] : memref<2x16x128xf32, #tpu.memory_space<vmem>> -> memref<1x1x128xf32, #tpu.memory_space<vmem>>
      %103 = tpu.memref_squeeze %102 : memref<1x1x128xf32, #tpu.memory_space<vmem>> -> memref<1x128xf32, #tpu.memory_space<vmem>>
      %104 = tpu.memref_slice %arg7[%33] : memref<2x!tpu.dma_semaphore, #tpu.memory_space<semaphore_mem>> -> memref<1x!tpu.dma_semaphore, #tpu.memory_space<semaphore_mem>>
      %105 = tpu.memref_squeeze %104 : memref<1x!tpu.dma_semaphore, #tpu.memory_space<semaphore_mem>> -> memref<!tpu.dma_semaphore, #tpu.memory_space<semaphore_mem>>
      tpu.enqueue_dma source(%101 : memref<1x128xf32, #tpu.memory_space<any>>) target(%103 : memref<1x128xf32, #tpu.memory_space<vmem>>) target_semaphore(%105 : memref<!tpu.dma_semaphore, #tpu.memory_space<semaphore_mem>>)
      %c8_i32 = arith.constant 8 : i32
      %106 = arith.addi %0, %c8_i32 : i32
      %107 = arith.index_cast %32 : i32 to index
      %108 = arith.index_cast %106 : i32 to index
      %109 = memref.load %arg2[%107, %108] : memref<2x16xi32, #tpu.memory_space<smem>>
      %c0_i32_47 = arith.constant 0 : i32
      %110 = tpu.memref_slice %arg3[%109, %c0_i32_47] : memref<512x128xf32, #tpu.memory_space<any>> -> memref<1x128xf32, #tpu.memory_space<any>>
      %c8_i32_48 = arith.constant 8 : i32
      %c0_i32_49 = arith.constant 0 : i32
      %111 = tpu.memref_slice %arg6[%33, %c8_i32_48, %c0_i32_49] : memref<2x16x128xf32, #tpu.memory_space<vmem>> -> memref<1x1x128xf32, #tpu.memory_space<vmem>>
      %112 = tpu.memref_squeeze %111 : memref<1x1x128xf32, #tpu.memory_space<vmem>> -> memref<1x128xf32, #tpu.memory_space<vmem>>
      %113 = tpu.memref_slice %arg7[%33] : memref<2x!tpu.dma_semaphore, #tpu.memory_space<semaphore_mem>> -> memref<1x!tpu.dma_semaphore, #tpu.memory_space<semaphore_mem>>
      %114 = tpu.memref_squeeze %113 : memref<1x!tpu.dma_semaphore, #tpu.memory_space<semaphore_mem>> -> memref<!tpu.dma_semaphore, #tpu.memory_space<semaphore_mem>>
      tpu.enqueue_dma source(%110 : memref<1x128xf32, #tpu.memory_space<any>>) target(%112 : memref<1x128xf32, #tpu.memory_space<vmem>>) target_semaphore(%114 : memref<!tpu.dma_semaphore, #tpu.memory_space<semaphore_mem>>)
      %c9_i32 = arith.constant 9 : i32
      %115 = arith.addi %0, %c9_i32 : i32
      %116 = arith.index_cast %32 : i32 to index
      %117 = arith.index_cast %115 : i32 to index
      %118 = memref.load %arg2[%116, %117] : memref<2x16xi32, #tpu.memory_space<smem>>
      %c0_i32_50 = arith.constant 0 : i32
      %119 = tpu.memref_slice %arg3[%118, %c0_i32_50] : memref<512x128xf32, #tpu.memory_space<any>> -> memref<1x128xf32, #tpu.memory_space<any>>
      %c9_i32_51 = arith.constant 9 : i32
      %c0_i32_52 = arith.constant 0 : i32
      %120 = tpu.memref_slice %arg6[%33, %c9_i32_51, %c0_i32_52] : memref<2x16x128xf32, #tpu.memory_space<vmem>> -> memref<1x1x128xf32, #tpu.memory_space<vmem>>
      %121 = tpu.memref_squeeze %120 : memref<1x1x128xf32, #tpu.memory_space<vmem>> -> memref<1x128xf32, #tpu.memory_space<vmem>>
      %122 = tpu.memref_slice %arg7[%33] : memref<2x!tpu.dma_semaphore, #tpu.memory_space<semaphore_mem>> -> memref<1x!tpu.dma_semaphore, #tpu.memory_space<semaphore_mem>>
      %123 = tpu.memref_squeeze %122 : memref<1x!tpu.dma_semaphore, #tpu.memory_space<semaphore_mem>> -> memref<!tpu.dma_semaphore, #tpu.memory_space<semaphore_mem>>
      tpu.enqueue_dma source(%119 : memref<1x128xf32, #tpu.memory_space<any>>) target(%121 : memref<1x128xf32, #tpu.memory_space<vmem>>) target_semaphore(%123 : memref<!tpu.dma_semaphore, #tpu.memory_space<semaphore_mem>>)
      %c10_i32 = arith.constant 10 : i32
      %124 = arith.addi %0, %c10_i32 : i32
      %125 = arith.index_cast %32 : i32 to index
      %126 = arith.index_cast %124 : i32 to index
      %127 = memref.load %arg2[%125, %126] : memref<2x16xi32, #tpu.memory_space<smem>>
      %c0_i32_53 = arith.constant 0 : i32
      %128 = tpu.memref_slice %arg3[%127, %c0_i32_53] : memref<512x128xf32, #tpu.memory_space<any>> -> memref<1x128xf32, #tpu.memory_space<any>>
      %c10_i32_54 = arith.constant 10 : i32
      %c0_i32_55 = arith.constant 0 : i32
      %129 = tpu.memref_slice %arg6[%33, %c10_i32_54, %c0_i32_55] : memref<2x16x128xf32, #tpu.memory_space<vmem>> -> memref<1x1x128xf32, #tpu.memory_space<vmem>>
      %130 = tpu.memref_squeeze %129 : memref<1x1x128xf32, #tpu.memory_space<vmem>> -> memref<1x128xf32, #tpu.memory_space<vmem>>
      %131 = tpu.memref_slice %arg7[%33] : memref<2x!tpu.dma_semaphore, #tpu.memory_space<semaphore_mem>> -> memref<1x!tpu.dma_semaphore, #tpu.memory_space<semaphore_mem>>
      %132 = tpu.memref_squeeze %131 : memref<1x!tpu.dma_semaphore, #tpu.memory_space<semaphore_mem>> -> memref<!tpu.dma_semaphore, #tpu.memory_space<semaphore_mem>>
      tpu.enqueue_dma source(%128 : memref<1x128xf32, #tpu.memory_space<any>>) target(%130 : memref<1x128xf32, #tpu.memory_space<vmem>>) target_semaphore(%132 : memref<!tpu.dma_semaphore, #tpu.memory_space<semaphore_mem>>)
      %c11_i32 = arith.constant 11 : i32
      %133 = arith.addi %0, %c11_i32 : i32
      %134 = arith.index_cast %32 : i32 to index
      %135 = arith.index_cast %133 : i32 to index
      %136 = memref.load %arg2[%134, %135] : memref<2x16xi32, #tpu.memory_space<smem>>
      %c0_i32_56 = arith.constant 0 : i32
      %137 = tpu.memref_slice %arg3[%136, %c0_i32_56] : memref<512x128xf32, #tpu.memory_space<any>> -> memref<1x128xf32, #tpu.memory_space<any>>
      %c11_i32_57 = arith.constant 11 : i32
      %c0_i32_58 = arith.constant 0 : i32
      %138 = tpu.memref_slice %arg6[%33, %c11_i32_57, %c0_i32_58] : memref<2x16x128xf32, #tpu.memory_space<vmem>> -> memref<1x1x128xf32, #tpu.memory_space<vmem>>
      %139 = tpu.memref_squeeze %138 : memref<1x1x128xf32, #tpu.memory_space<vmem>> -> memref<1x128xf32, #tpu.memory_space<vmem>>
      %140 = tpu.memref_slice %arg7[%33] : memref<2x!tpu.dma_semaphore, #tpu.memory_space<semaphore_mem>> -> memref<1x!tpu.dma_semaphore, #tpu.memory_space<semaphore_mem>>
      %141 = tpu.memref_squeeze %140 : memref<1x!tpu.dma_semaphore, #tpu.memory_space<semaphore_mem>> -> memref<!tpu.dma_semaphore, #tpu.memory_space<semaphore_mem>>
      tpu.enqueue_dma source(%137 : memref<1x128xf32, #tpu.memory_space<any>>) target(%139 : memref<1x128xf32, #tpu.memory_space<vmem>>) target_semaphore(%141 : memref<!tpu.dma_semaphore, #tpu.memory_space<semaphore_mem>>)
      %c12_i32 = arith.constant 12 : i32
      %142 = arith.addi %0, %c12_i32 : i32
      %143 = arith.index_cast %32 : i32 to index
      %144 = arith.index_cast %142 : i32 to index
      %145 = memref.load %arg2[%143, %144] : memref<2x16xi32, #tpu.memory_space<smem>>
      %c0_i32_59 = arith.constant 0 : i32
      %146 = tpu.memref_slice %arg3[%145, %c0_i32_59] : memref<512x128xf32, #tpu.memory_space<any>> -> memref<1x128xf32, #tpu.memory_space<any>>
      %c12_i32_60 = arith.constant 12 : i32
      %c0_i32_61 = arith.constant 0 : i32
      %147 = tpu.memref_slice %arg6[%33, %c12_i32_60, %c0_i32_61] : memref<2x16x128xf32, #tpu.memory_space<vmem>> -> memref<1x1x128xf32, #tpu.memory_space<vmem>>
      %148 = tpu.memref_squeeze %147 : memref<1x1x128xf32, #tpu.memory_space<vmem>> -> memref<1x128xf32, #tpu.memory_space<vmem>>
      %149 = tpu.memref_slice %arg7[%33] : memref<2x!tpu.dma_semaphore, #tpu.memory_space<semaphore_mem>> -> memref<1x!tpu.dma_semaphore, #tpu.memory_space<semaphore_mem>>
      %150 = tpu.memref_squeeze %149 : memref<1x!tpu.dma_semaphore, #tpu.memory_space<semaphore_mem>> -> memref<!tpu.dma_semaphore, #tpu.memory_space<semaphore_mem>>
      tpu.enqueue_dma source(%146 : memref<1x128xf32, #tpu.memory_space<any>>) target(%148 : memref<1x128xf32, #tpu.memory_space<vmem>>) target_semaphore(%150 : memref<!tpu.dma_semaphore, #tpu.memory_space<semaphore_mem>>)
      %c13_i32 = arith.constant 13 : i32
      %151 = arith.addi %0, %c13_i32 : i32
      %152 = arith.index_cast %32 : i32 to index
      %153 = arith.index_cast %151 : i32 to index
      %154 = memref.load %arg2[%152, %153] : memref<2x16xi32, #tpu.memory_space<smem>>
      %c0_i32_62 = arith.constant 0 : i32
      %155 = tpu.memref_slice %arg3[%154, %c0_i32_62] : memref<512x128xf32, #tpu.memory_space<any>> -> memref<1x128xf32, #tpu.memory_space<any>>
      %c13_i32_63 = arith.constant 13 : i32
      %c0_i32_64 = arith.constant 0 : i32
      %156 = tpu.memref_slice %arg6[%33, %c13_i32_63, %c0_i32_64] : memref<2x16x128xf32, #tpu.memory_space<vmem>> -> memref<1x1x128xf32, #tpu.memory_space<vmem>>
      %157 = tpu.memref_squeeze %156 : memref<1x1x128xf32, #tpu.memory_space<vmem>> -> memref<1x128xf32, #tpu.memory_space<vmem>>
      %158 = tpu.memref_slice %arg7[%33] : memref<2x!tpu.dma_semaphore, #tpu.memory_space<semaphore_mem>> -> memref<1x!tpu.dma_semaphore, #tpu.memory_space<semaphore_mem>>
      %159 = tpu.memref_squeeze %158 : memref<1x!tpu.dma_semaphore, #tpu.memory_space<semaphore_mem>> -> memref<!tpu.dma_semaphore, #tpu.memory_space<semaphore_mem>>
      tpu.enqueue_dma source(%155 : memref<1x128xf32, #tpu.memory_space<any>>) target(%157 : memref<1x128xf32, #tpu.memory_space<vmem>>) target_semaphore(%159 : memref<!tpu.dma_semaphore, #tpu.memory_space<semaphore_mem>>)
      %c14_i32 = arith.constant 14 : i32
      %160 = arith.addi %0, %c14_i32 : i32
      %161 = arith.index_cast %32 : i32 to index
      %162 = arith.index_cast %160 : i32 to index
      %163 = memref.load %arg2[%161, %162] : memref<2x16xi32, #tpu.memory_space<smem>>
      %c0_i32_65 = arith.constant 0 : i32
      %164 = tpu.memref_slice %arg3[%163, %c0_i32_65] : memref<512x128xf32, #tpu.memory_space<any>> -> memref<1x128xf32, #tpu.memory_space<any>>
      %c14_i32_66 = arith.constant 14 : i32
      %c0_i32_67 = arith.constant 0 : i32
      %165 = tpu.memref_slice %arg6[%33, %c14_i32_66, %c0_i32_67] : memref<2x16x128xf32, #tpu.memory_space<vmem>> -> memref<1x1x128xf32, #tpu.memory_space<vmem>>
      %166 = tpu.memref_squeeze %165 : memref<1x1x128xf32, #tpu.memory_space<vmem>> -> memref<1x128xf32, #tpu.memory_space<vmem>>
      %167 = tpu.memref_slice %arg7[%33] : memref<2x!tpu.dma_semaphore, #tpu.memory_space<semaphore_mem>> -> memref<1x!tpu.dma_semaphore, #tpu.memory_space<semaphore_mem>>
      %168 = tpu.memref_squeeze %167 : memref<1x!tpu.dma_semaphore, #tpu.memory_space<semaphore_mem>> -> memref<!tpu.dma_semaphore, #tpu.memory_space<semaphore_mem>>
      tpu.enqueue_dma source(%164 : memref<1x128xf32, #tpu.memory_space<any>>) target(%166 : memref<1x128xf32, #tpu.memory_space<vmem>>) target_semaphore(%168 : memref<!tpu.dma_semaphore, #tpu.memory_space<semaphore_mem>>)
      %c15_i32 = arith.constant 15 : i32
      %169 = arith.addi %0, %c15_i32 : i32
      %170 = arith.index_cast %32 : i32 to index
      %171 = arith.index_cast %169 : i32 to index
      %172 = memref.load %arg2[%170, %171] : memref<2x16xi32, #tpu.memory_space<smem>>
      %c0_i32_68 = arith.constant 0 : i32
      %173 = tpu.memref_slice %arg3[%172, %c0_i32_68] : memref<512x128xf32, #tpu.memory_space<any>> -> memref<1x128xf32, #tpu.memory_space<any>>
      %c15_i32_69 = arith.constant 15 : i32
      %c0_i32_70 = arith.constant 0 : i32
      %174 = tpu.memref_slice %arg6[%33, %c15_i32_69, %c0_i32_70] : memref<2x16x128xf32, #tpu.memory_space<vmem>> -> memref<1x1x128xf32, #tpu.memory_space<vmem>>
      %175 = tpu.memref_squeeze %174 : memref<1x1x128xf32, #tpu.memory_space<vmem>> -> memref<1x128xf32, #tpu.memory_space<vmem>>
      %176 = tpu.memref_slice %arg7[%33] : memref<2x!tpu.dma_semaphore, #tpu.memory_space<semaphore_mem>> -> memref<1x!tpu.dma_semaphore, #tpu.memory_space<semaphore_mem>>
      %177 = tpu.memref_squeeze %176 : memref<1x!tpu.dma_semaphore, #tpu.memory_space<semaphore_mem>> -> memref<!tpu.dma_semaphore, #tpu.memory_space<semaphore_mem>>
      tpu.enqueue_dma source(%173 : memref<1x128xf32, #tpu.memory_space<any>>) target(%175 : memref<1x128xf32, #tpu.memory_space<vmem>>) target_semaphore(%177 : memref<!tpu.dma_semaphore, #tpu.memory_space<semaphore_mem>>)
    } else {
    }
    %c0_i32_8 = arith.constant 0 : i32
    %c0_i32_9 = arith.constant 0 : i32
    %18 = tpu.memref_slice %arg6[%10, %c0_i32_8, %c0_i32_9] : memref<2x16x128xf32, #tpu.memory_space<vmem>> -> memref<1x16x128xf32, #tpu.memory_space<vmem>>
    %19 = tpu.memref_squeeze %18 : memref<1x16x128xf32, #tpu.memory_space<vmem>> -> memref<16x128xf32, #tpu.memory_space<vmem>>
    %c0_i32_10 = arith.constant 0 : i32
    %c0_i32_11 = arith.constant 0 : i32
    %20 = tpu.memref_slice %arg6[%10, %c0_i32_10, %c0_i32_11] : memref<2x16x128xf32, #tpu.memory_space<vmem>> -> memref<1x16x128xf32, #tpu.memory_space<vmem>>
    %21 = tpu.memref_squeeze %20 : memref<1x16x128xf32, #tpu.memory_space<vmem>> -> memref<16x128xf32, #tpu.memory_space<vmem>>
    %22 = tpu.memref_slice %arg7[%10] : memref<2x!tpu.dma_semaphore, #tpu.memory_space<semaphore_mem>> -> memref<1x!tpu.dma_semaphore, #tpu.memory_space<semaphore_mem>>
    %23 = tpu.memref_squeeze %22 : memref<1x!tpu.dma_semaphore, #tpu.memory_space<semaphore_mem>> -> memref<!tpu.dma_semaphore, #tpu.memory_space<semaphore_mem>>
    tpu.wait_dma2 semaphore(%23 : memref<!tpu.dma_semaphore, #tpu.memory_space<semaphore_mem>>) src(%19 : memref<16x128xf32, #tpu.memory_space<vmem>>) dst(%21 : memref<16x128xf32, #tpu.memory_space<vmem>>)
    %24 = arith.index_cast %10 : i32 to index
    %c0 = arith.constant 0 : index
    %c0_12 = arith.constant 0 : index
    %25 = vector.load %arg6[%24, %c0, %c0_12] : memref<2x16x128xf32, #tpu.memory_space<vmem>>, vector<1x16x128xf32>
    %26 = vector.shape_cast %25 : vector<1x16x128xf32> to vector<16x128xf32>
    %c0_13 = arith.constant 0 : index
    %c0_14 = arith.constant 0 : index
    %27 = vector.load %arg4[%c0_13, %c0_14] : memref<16x128xf32, #tpu.memory_space<vmem>>, vector<16x128xf32>
    %28 = arith.addf %26, %27 : vector<16x128xf32>
    %c0_15 = arith.constant 0 : index
    %c0_16 = arith.constant 0 : index
    %c0_17 = arith.constant 0 : index
    %29 = vector.load %arg5[%c0_15, %c0_16, %c0_17] : memref<1x16x128xf32, #tpu.memory_space<vmem>>, vector<1x16x128xf32>
    %30 = vector.shape_cast %29 : vector<1x16x128xf32> to vector<16x128xf32>
    %31 = vector.shape_cast %28 : vector<16x128xf32> to vector<1x16x128xf32>
    tpu.vector_store %arg5[%c0_15, %c0_16, %c0_17], %31 {strides = array<i32>} : memref<1x16x128xf32, #tpu.memory_space<vmem>>, vector<1x16x128xf32>,
    return
  }
  func.func @transform_1(%arg0: i32, %arg1: i32, %arg2: memref<2x16xi32, #tpu.memory_space<smem>>) -> (i32, i32) {
    %c0_i32 = arith.constant 0 : i32
    %c0_i32_0 = arith.constant 0 : i32
    return %arg0, %c0_i32 : i32, i32
  }
  func.func @transform_2(%arg0: i32, %arg1: i32, %arg2: memref<2x16xi32, #tpu.memory_space<smem>>) -> (i32, i32, i32) {
    %c0_i32 = arith.constant 0 : i32
    %c0_i32_0 = arith.constant 0 : i32
    return %arg1, %arg0, %c0_i32 : i32, i32, i32
  }
}

</mosaic_0001>

<bundles_post_ra>
// kernel: tpu_custom_call.1
= control target key start
LH: loop header
LB: loop body
LE: loop exit
PB: predicated region body
PF: predicated region fallthrough
CT: control target
= control target key end

     0   :  { %s2266_s12 = smov [#allocation5]   ;;  %s3047_s0 = inlined_call_operand.hbm [shape: s32[2,16], index: 0, kind: input, shape index: {}]   ;;  %s3048_s1 = inlined_call_operand.hbm [shape: f32[512,128], index: 1, kind: input, shape index: {}]   ;;  %s3049_s2 = inlined_call_operand.hbm [shape: f32[33,128], index: 2, kind: input, shape index: {}]   ;;  %s3050_s3 = inlined_call_operand.hbm [shape: f32[2,16,128], index: 3, kind: output, shape index: {}]  }
   0x1   :  { %3057 = sst [smem:[#allocation86_spill]] %s3049_s2 }
   0x2   :  { %9 = dma.hbm_to_smem %s3047_s0, 32, %s2266_s12, [#allocation4] }
   0x3   :  { %2230 = dma.done.wait [#allocation4], 32 }
   0x4   :  { %2231 = vsyncadd [#allocation4], 4294967264 }
   0x5   :  { %11 = sfence }
   0x6   :  { %12 = vsyncpa [#allocation7], 0 }
   0x7   :  { %13 = vsyncpa [#allocation8], 0 }
   0x8   :  { %15 = vsyncpa [#allocation8 + $0x1], 0  ;;  %s2298_s15 = smov 0   ;;  %s2300_s16 = smov 0  }
   0x9   :  { %s2302_s17 = smov 0   ;;  %s2304_s18 = smov 0  }
   0xa   :  { %s2306_s19 = smov 0   ;;  %s2308_s20 = smov 0  }
   0xb LB: > { %3058 = sst [smem:[#allocation80_spill]] %s2244_s15  ;;  %s1222_s0 = sadd.s32 4294967295, %s2264_s20   ;;  %s2264_s20 = sphi %s2308_s20, %s21_s20   ;;  %s2260_s19 = sphi %s2306_s19, %s3075_s19   ;;  %s2256_s18 = sphi %s2304_s18, %s3074_s18   ;;  %s2252_s17 = sphi %s2302_s17, %s3073_s17   ;;  %s2248_s16 = sphi %s2300_s16, %s3077_s16   ;;  %s2244_s15 = sphi %s2298_s15, %s3076_s15  }
   0xc   : > { %3059 = sst [smem:[#allocation81_spill]] %s2252_s17  ;;  %s1223_s21 = sadd.s32 4294967294, %s2264_s20  }
   0xd   : > { %3060 = sst [smem:[#allocation82_spill]] %s2260_s19  ;;  %s30_s22 = sadd.s32 1, %s2260_s19 }
   0xe   : > { %s68_s23 = sadd.s32 1, %s2252_s17  ;;  %p31_p0 = scmp.ge.s32.totalorder %s30_s22, 2 }
   0xf   : > { %p78_p1 = scmp.ne.s32.totalorder %s2252_s17, %s2248_s16  ;;  %p79_p2 = scmp.eq.s32.totalorder %s1222_s0, 1 }
  0x10   : > { %p84_p3 = scmp.ne.s32.totalorder %s2248_s16, %s2244_s15  ;;  %s3079_s22 = smov (%p31_p0, %s30_s22), 0 }
  0x11   : > { %3061 = sst [smem:[#allocation83_spill]] %s3079_s22  ;;  %p2338_p4 = por %p79_p2, %p78_p1 }
  0x12   : > { %p85_p5 = scmp.eq.s32.totalorder %s1223_s21, 1  ;;  %s63_s25 = ssub.s32 %s2260_s19, %s3079_s22 }
  0x13   : > { %p1224_p6 = scmp.ge.s32.totalorder %s2264_s20, 1  ;;  %p66_p7 = scmp.eq.s32.totalorder %s63_s25, 0 }
  0x14   : > { %p2345_p8 = por %p85_p5, %p84_p3  ;;  %p92_p9 = scmp.lt.s32.totalorder %s2264_s20, 3 }
  0x15   : > { %s2351_s27 = scalar_select %p66_p7, %s2252_s17, %s68_s23  }
  0x16   : > { %s3063_s26 = scalar_select %p2345_p8, 1, 0 }
  0x17   : > { %3065 = sst [smem:[#allocation85_spill]] %s2351_s27  ;;  %p2353_p10 = pnand %p1224_p6, %p92_p9 }
  0x18   : > { %3064 = sst [smem:[#allocation84_spill]] %s3063_s26  ;;  %p2357_p11 = scmp.eq.s32.totalorder %s1222_s0, 0 }
  0x19   : > { %p1377_p12 = pneg %p2353_p10  ;;  %s2267_s30 = smov [#allocation6]  }
  0x1a   : > { %s113_s4 = sshll.u32 %s2267_s30, 4  ;;  %s114_s4 = int_to_ptr.vmem [resolvable:$true] %s113_s4 }
  0x1b   : > { %p1378_p13 = pnand %p2357_p11, %p1377_p12  ;;  %s1461_s5 = scalar_lea.vmem %s114_s4, 256 }
  0x1c   : > { %p1462_p1 = scmp.ne.s32.totalorder %s114_s4, %s1461_s5  ;;  %p1469_p5 = scmp.lt.s32.totalorder %s114_s4, %s114_s4 }
  0x1d   : > { %p1452_p0 = pneg %p1378_p13  ;;  %p1470_p6 = scmp.lt.s32.totalorder %s1461_s5, %s1461_s5 }
  0x1f   : > { %p1464_p2 = pnand %p1462_p1, %p1452_p0  ;;  %p1471_p7 = por %p1470_p6, %p1469_p5 }
  0x21   : > { %p1465_p3 = pneg %p1464_p2 }
  0x23   : > { %p1472_p9 = pnand %p1471_p7, %p1465_p3 }
  0x25   : > { %1475 = shalt.err (!%p1472_p9)
}
  0x26   : > { %s2268_s6 = smov 128   ;;  %s2269_s7 = smov 8  }
  0x27   : > { %s3068_s2 = sld [smem:[#allocation86_spill]] }
  0x29   : > { %129 = sbr.rel (%p2353_p10) target bundleno = 743 (0x2e7), region = 24 }
  0x2d   : > { %1380 = dma.hbm_to_vmem [thread:$0]  (!%p1378_p13), %s3068_s2, 256, %s114_s4, [#allocation7], %s2268_s6, %s2268_s6, %s2269_s7  }
  0x2e   : > { %2233 = dma.done.wait (%p2357_p11), [#allocation7], 256  }
  0x2f   : > { %2235 = vsyncadd (%p2357_p11), [#allocation7], 4294967040  ;;  %s3051_s10 = sand.u32 1, %s2248_s16   ;;  %p151_p12 = scmp.lt.s32.totalorder %s2256_s18, 0 }
  0x30   : > { %s1228_s11 = sshll.u32 %s3051_s10, 4  ;;  %s152_s12 = ssub.s32 0, %s2256_s18 }
  0x31   : > { %s1229_s13 = smin.u32 %s2256_s18, %s152_s12  ;;  %s2382_s23 = scalar_lea.vmem [#allocation9], %s1228_s11 }
  0x32   : > { %s154_s14 = sand.u32 1, %s1229_s13   ;;  %p1232_p11 = scmp.ne.s32.totalorder %s2256_s18, 0 }
  0x33   : > { %s155_s0 = ssub.s32 0, %s154_s14  ;;  %s2386_s25 = sshll.u32 (!%p1232_p11), %s2256_s18, 7 }
  0x34   : > { %s3081_s0 = smov (!%p151_p12, %s155_s0), %s154_s14  ;;  %166 = sbr.rel (%p1232_p11) target bundleno = 383 (0x17f), region = 32 }
  0x35   : > { %p1231_p10 = scmp.lt.s32.totalorder %s3081_s0, 0  ;;  %s161_s21 = sadd.s32 2, %s3081_s0 }
  0x36   : > { %s174_s29 = sld [smem:[#allocation5 + %s2386_s25]] (!%p1232_p11)  ;;  %s198_s5 = sadd.s32 (!%p1232_p11), 1, %s2386_s25 }
  0x37   : > { %s3083_s21 = smov (!%p1231_p10, %s161_s21), %s3081_s0  ;;  %s2396_s6 = sld [smem:[#allocation5 + %s198_s5]] (!%p1232_p11) }
  0x38   : > { %s1235_s28 = sshll.u32 (!%p1232_p11), %s3083_s21, 4  ;;  %s222_s9 = sadd.s32 (!%p1232_p11), 2, %s2386_s25 }
  0x39   : > { %s2390_s30 = scalar_lea.vmem [#allocation2], %s1235_s28  ;;  %s2402_s11 = sld [smem:[#allocation5 + %s222_s9]] }
  0x3a   : > { %s187_s4 = sshll.u32 %s2390_s30, 4  ;;  %s1025_s7 = scalar_lea.vmem %s2390_s30, 1 [#allocation2]  ;;  %s2393_s4 = int_to_ptr.vmem [resolvable:$true] %s187_s4 }
  0x3b   : > { %s211_s8 = sshll.u32 %s1025_s7, 4  ;;  %s1030_s13 = scalar_lea.vmem %s2390_s30, 2 [#allocation2]  ;;  %s2400_s8 = int_to_ptr.vmem [resolvable:$true] %s211_s8 }
  0x3c   : > { %s1234_s12 = sshll.u32 %s174_s29, 4  ;;  %s235_s10 = sshll.u32 %s1030_s13, 4  ;;  %s2433_s10 = int_to_ptr.vmem [resolvable:$true] %s235_s10 }
  0x3d   : > { %s176_s28 = scalar_lea.hbm %s3048_s1, %s1234_s12  ;;  %s2409_s2 = scalar_lea.sflag [#allocation3], %s3083_s21 }
  0x3e   : > { %s1476_s22 = scalar_lea.hbm %s176_s28, 16  ;;  %s2414_s7 = scalar_lea.hbm %s3048_s1, 8192 }
  0x3f   : > { %p1477_p13 = scmp.ne.s32.totalorder %s176_s28, %s1476_s22  ;;  %p1479_p0 = scmp.lt.s32.totalorder %s176_s28, %s3048_s1 }
  0x40   : > { %p1480_p1 = scmp.lt.s32.totalorder %s2414_s7, %s1476_s22 }
  0x42   : > { %p1481_p2 = por %p1480_p1, %p1479_p0 }
  0x44   : > { %p1482_p3 = pnand %p1481_p2, %p1477_p13 }
  0x46   : > { %1485 = shalt.err (!%p1482_p3)  }
  0x47   : > { %s1486_s29 = scalar_lea.vmem %s2393_s4, 16  ;;  %s2270_s9 = smov [#allocation2]  }
  0x48   : > { %p1487_p5 = scmp.ne.s32.totalorder %s2393_s4, %s1486_s29  ;;  %s1488_s12 = sshll.u32 %s2270_s9, 4  ;;  %s2422_s12 = int_to_ptr.vmem [resolvable:$false] %s1488_s12 }
  0x49   : > { %s2425_s19 = scalar_lea.vmem %s2422_s12, 512  ;;  %p1491_p6 = scmp.lt.s32.totalorder %s2393_s4, %s2422_s12 }
  0x4a   : > { %p1492_p7 = scmp.lt.s32.totalorder %s2425_s19, %s1486_s29 }
  0x4c   : > { %p1493_p9 = por %p1492_p7, %p1491_p6 }
  0x4e   : > { %p1494_p12 = pnand %p1493_p9, %p1487_p5 }
  0x50   : > { %1497 = shalt.err (!%p1494_p12)  }
  0x51   : > { %190 = dma.hbm_to_vmem [thread:$0]  %s176_s28, 16, %s2393_s4, %s2409_s2 }
  0x52   : > { %s1237_s17 = sshll.u32 %s2396_s6, 4  ;;  %s246_s14 = sadd.s32 3, %s2386_s25 }
  0x53   : > { %s201_s13 = scalar_lea.hbm %s3048_s1, %s1237_s17 }
  0x54   : > { %s1498_s0 = scalar_lea.hbm %s201_s13, 16  ;;  %p1501_p11 = scmp.lt.s32.totalorder %s201_s13, %s3048_s1 }
  0x55   : > { %p1499_p10 = scmp.ne.s32.totalorder %s201_s13, %s1498_s0  ;;  %p1502_p13 = scmp.lt.s32.totalorder %s2414_s7, %s1498_s0 }
  0x57   : > { %p1503_p0 = por %p1502_p13, %p1501_p11 }
  0x59   : > { %p1504_p1 = pnand %p1503_p0, %p1499_p10 }
  0x5b   : > { %1507 = shalt.err (!%p1504_p1)  }
  0x5c   : > { %s1508_s4 = scalar_lea.vmem %s2400_s8, 16  ;;  %p1513_p3 = scmp.lt.s32.totalorder %s2400_s8, %s2422_s12 }
  0x5d   : > { %p1509_p2 = scmp.ne.s32.totalorder %s2400_s8, %s1508_s4  ;;  %p1514_p5 = scmp.lt.s32.totalorder %s2425_s19, %s1508_s4 }
  0x5f   : > { %p1515_p6 = por %p1514_p5, %p1513_p3 }
  0x61   : > { %p1516_p7 = pnand %p1515_p6, %p1509_p2 }
  0x63   : > { %1519 = shalt.err (!%p1516_p7)  }
  0x64   : > { %214 = dma.hbm_to_vmem [thread:$0]  %s201_s13, 16, %s2400_s8, %s2409_s2 }
  0x65   : > { %s1240_s6 = sshll.u32 %s2402_s11, 4  ;;  %s247_s28 = sld [smem:[#allocation5 + %s246_s14]] }
  0x66   : > { %s225_s22 = scalar_lea.hbm %s3048_s1, %s1240_s6  ;;  %s1035_s27 = scalar_lea.vmem %s2390_s30, 3 [#allocation2] }
  0x67   : > { %s1520_s0 = scalar_lea.hbm %s225_s22, 16  ;;  %p1523_p12 = scmp.lt.s32.totalorder %s225_s22, %s3048_s1 }
  0x68   : > { %p1521_p9 = scmp.ne.s32.totalorder %s225_s22, %s1520_s0  ;;  %p1524_p10 = scmp.lt.s32.totalorder %s2414_s7, %s1520_s0 }
  0x6a   : > { %p1525_p11 = por %p1524_p10, %p1523_p12 }
  0x6c   : > { %p1526_p13 = pnand %p1525_p11, %p1521_p9 }
  0x6e   : > { %1529 = shalt.err (!%p1526_p13)  }
  0x6f   : > { %s1530_s8 = scalar_lea.vmem %s2433_s10, 16  ;;  %p1535_p1 = scmp.lt.s32.totalorder %s2433_s10, %s2422_s12 }
  0x70   : > { %p1531_p0 = scmp.ne.s32.totalorder %s2433_s10, %s1530_s8  ;;  %p1536_p2 = scmp.lt.s32.totalorder %s2425_s19, %s1530_s8 }
  0x72   : > { %p1537_p3 = por %p1536_p2, %p1535_p1 }
  0x74   : > { %p1538_p5 = pnand %p1537_p3, %p1531_p0 }
  0x76   : > { %1541 = shalt.err (!%p1538_p5)  }
  0x77   : > { %238 = dma.hbm_to_vmem [thread:$0]  %s225_s22, 16, %s2433_s10, %s2409_s2 }
  0x78   : > { %s259_s11 = sshll.u32 %s1035_s27, 4  ;;  %s270_s13 = sadd.s32 4, %s2386_s25  ;;  %s260_s11 = int_to_ptr.vmem [resolvable:$true] %s259_s11 }
  0x79   : > { %s271_s14 = sld [smem:[#allocation5 + %s270_s13]]  ;;  %s1040_s4 = scalar_lea.vmem %s2390_s30, 4 [#allocation2] }
  0x7a   : > { %s294_s6 = sadd.s32 5, %s2386_s25  ;;  %s1243_s9 = sshll.u32 %s247_s28, 4 }
  0x7b   : > { %s283_s17 = sshll.u32 %s1040_s4, 4  ;;  %s249_s29 = scalar_lea.hbm %s3048_s1, %s1243_s9  ;;  %s2472_s17 = int_to_ptr.vmem [resolvable:$true] %s283_s17 }
  0x7c   : > { %s1542_s8 = scalar_lea.hbm %s249_s29, 16  ;;  %p1545_p7 = scmp.lt.s32.totalorder %s249_s29, %s3048_s1 }
  0x7d   : > { %p1543_p6 = scmp.ne.s32.totalorder %s249_s29, %s1542_s8  ;;  %p1546_p9 = scmp.lt.s32.totalorder %s2414_s7, %s1542_s8 }
  0x7f   : > { %p1547_p12 = por %p1546_p9, %p1545_p7 }
  0x81   : > { %p1548_p10 = pnand %p1547_p12, %p1543_p6 }
  0x83   : > { %1551 = shalt.err (!%p1548_p10)  }
  0x84   : > { %s1552_s10 = scalar_lea.vmem %s260_s11, 16  ;;  %p1557_p13 = scmp.lt.s32.totalorder %s260_s11, %s2422_s12 }
  0x85   : > { %p1553_p11 = scmp.ne.s32.totalorder %s260_s11, %s1552_s10  ;;  %p1558_p0 = scmp.lt.s32.totalorder %s2425_s19, %s1552_s10 }
  0x87   : > { %p1559_p1 = por %p1558_p0, %p1557_p13 }
  0x89   : > { %p1560_p2 = pnand %p1559_p1, %p1553_p11 }
  0x8b   : > { %1563 = shalt.err (!%p1560_p2)  }
  0x8c   : > { %262 = dma.hbm_to_vmem [thread:$0]  %s249_s29, 16, %s260_s11, %s2409_s2 }
  0x8d   : > { %s295_s28 = sld [smem:[#allocation5 + %s294_s6]]  ;;  %s1045_s15 = scalar_lea.vmem %s2390_s30, 5 [#allocation2] }
  0x8e   : > { %s1246_s26 = sshll.u32 %s271_s14, 4  ;;  %s307_s22 = sshll.u32 %s1045_s15, 4  ;;  %s2485_s22 = int_to_ptr.vmem [resolvable:$true] %s307_s22 }
  0x8f   : > { %s273_s4 = scalar_lea.hbm %s3048_s1, %s1246_s26 }
  0x90   : > { %s1564_s9 = scalar_lea.hbm %s273_s4, 16  ;;  %p1567_p5 = scmp.lt.s32.totalorder %s273_s4, %s3048_s1 }
  0x91   : > { %p1565_p3 = scmp.ne.s32.totalorder %s273_s4, %s1564_s9  ;;  %p1568_p6 = scmp.lt.s32.totalorder %s2414_s7, %s1564_s9 }
  0x93   : > { %p1569_p7 = por %p1568_p6, %p1567_p5 }
  0x95   : > { %p1570_p9 = pnand %p1569_p7, %p1565_p3 }
  0x97   : > { %1573 = shalt.err (!%p1570_p9)  }
  0x98   : > { %s1574_s11 = scalar_lea.vmem %s2472_s17, 16  ;;  %p1579_p10 = scmp.lt.s32.totalorder %s2472_s17, %s2422_s12 }
  0x99   : > { %p1575_p12 = scmp.ne.s32.totalorder %s2472_s17, %s1574_s11  ;;  %p1580_p11 = scmp.lt.s32.totalorder %s2425_s19, %s1574_s11 }
  0x9b   : > { %p1581_p13 = por %p1580_p11, %p1579_p10 }
  0x9d   : > { %p1582_p0 = pnand %p1581_p13, %p1575_p12 }
  0x9f   : > { %1585 = shalt.err (!%p1582_p0)  }
  0xa0   : > { %286 = dma.hbm_to_vmem [thread:$0]  %s273_s4, 16, %s2472_s17, %s2409_s2 }
  0xa1   : > { %s318_s14 = sadd.s32 6, %s2386_s25  ;;  %s1050_s6 = scalar_lea.vmem %s2390_s30, 6 [#allocation2] }
  0xa2   : > { %s319_s29 = sld [smem:[#allocation5 + %s318_s14]]  ;;  %s331_s8 = sshll.u32 %s1050_s6, 4  ;;  %s2500_s8 = int_to_ptr.vmem [resolvable:$true] %s331_s8 }
  0xa3   : > { %s1249_s10 = sshll.u32 %s295_s28, 4  ;;  %s342_s13 = sadd.s32 7, %s2386_s25 }
  0xa4   : > { %s297_s27 = scalar_lea.hbm %s3048_s1, %s1249_s10 }
  0xa5   : > { %s1586_s9 = scalar_lea.hbm %s297_s27, 16  ;;  %p1589_p2 = scmp.lt.s32.totalorder %s297_s27, %s3048_s1 }
  0xa6   : > { %p1587_p1 = scmp.ne.s32.totalorder %s297_s27, %s1586_s9  ;;  %p1590_p3 = scmp.lt.s32.totalorder %s2414_s7, %s1586_s9 }
  0xa8   : > { %p1591_p5 = por %p1590_p3, %p1589_p2 }
  0xaa   : > { %p1592_p6 = pnand %p1591_p5, %p1587_p1 }
  0xac   : > { %1595 = shalt.err (!%p1592_p6)  }
  0xad   : > { %s1596_s17 = scalar_lea.vmem %s2485_s22, 16  ;;  %p1601_p9 = scmp.lt.s32.totalorder %s2485_s22, %s2422_s12 }
  0xae   : > { %p1597_p7 = scmp.ne.s32.totalorder %s2485_s22, %s1596_s17  ;;  %p1602_p12 = scmp.lt.s32.totalorder %s2425_s19, %s1596_s17 }
  0xb0   : > { %p1603_p10 = por %p1602_p12, %p1601_p9 }
  0xb2   : > { %p1604_p11 = pnand %p1603_p10, %p1597_p7 }
  0xb4   : > { %1607 = shalt.err (!%p1604_p11)  }
  0xb5   : > { %310 = dma.hbm_to_vmem [thread:$0]  %s297_s27, 16, %s2485_s22, %s2409_s2 }
  0xb6   : > { %s343_s28 = sld [smem:[#allocation5 + %s342_s13]]  ;;  %s1055_s4 = scalar_lea.vmem %s2390_s30, 7 [#allocation2] }
  0xb7   : > { %s355_s11 = sshll.u32 %s1055_s4, 4  ;;  %s366_s14 = sadd.s32 8, %s2386_s25  ;;  %s2519_s11 = int_to_ptr.vmem [resolvable:$true] %s355_s11 }
  0xb8   : > { %s1252_s6 = sshll.u32 %s319_s29, 4  ;;  %s2524_s9 = sld [smem:[#allocation5 + %s366_s14]] }
  0xb9   : > { %s321_s26 = scalar_lea.hbm %s3048_s1, %s1252_s6 }
  0xba   : > { %s1608_s0 = scalar_lea.hbm %s321_s26, 16  ;;  %p1611_p0 = scmp.lt.s32.totalorder %s321_s26, %s3048_s1 }
  0xbb   : > { %p1609_p13 = scmp.ne.s32.totalorder %s321_s26, %s1608_s0  ;;  %p1612_p1 = scmp.lt.s32.totalorder %s2414_s7, %s1608_s0 }
  0xbd   : > { %p1613_p2 = por %p1612_p1, %p1611_p0 }
  0xbf   : > { %p1614_p3 = pnand %p1613_p2, %p1609_p13 }
  0xc1   : > { %1617 = shalt.err (!%p1614_p3)  }
  0xc2   : > { %s1618_s22 = scalar_lea.vmem %s2500_s8, 16  ;;  %p1623_p6 = scmp.lt.s32.totalorder %s2500_s8, %s2422_s12 }
  0xc3   : > { %p1619_p5 = scmp.ne.s32.totalorder %s2500_s8, %s1618_s22  ;;  %p1624_p7 = scmp.lt.s32.totalorder %s2425_s19, %s1618_s22 }
  0xc5   : > { %p1625_p9 = por %p1624_p7, %p1623_p6 }
  0xc7   : > { %p1626_p12 = pnand %p1625_p9, %p1619_p5 }
  0xc9   : > { %1629 = shalt.err (!%p1626_p12)  }
  0xca   : > { %334 = dma.hbm_to_vmem [thread:$0]  %s321_s26, 16, %s2500_s8, %s2409_s2 }
  0xcb   : > { %s1060_s29 = scalar_lea.vmem %s2390_s30, 8 [#allocation2]  ;;  %s390_s27 = sadd.s32 9, %s2386_s25 }
  0xcc   : > { %s1255_s13 = sshll.u32 %s343_s28, 4  ;;  %s379_s4 = sshll.u32 %s1060_s29, 4  ;;  %s2542_s4 = int_to_ptr.vmem [resolvable:$true] %s379_s4 }
  0xcd   : > { %s345_s10 = scalar_lea.hbm %s3048_s1, %s1255_s13 }
  0xce   : > { %s1630_s15 = scalar_lea.hbm %s345_s10, 16  ;;  %p1633_p11 = scmp.lt.s32.totalorder %s345_s10, %s3048_s1 }
  0xcf   : > { %p1631_p10 = scmp.ne.s32.totalorder %s345_s10, %s1630_s15  ;;  %p1634_p13 = scmp.lt.s32.totalorder %s2414_s7, %s1630_s15 }
  0xd1   : > { %p1635_p0 = por %p1634_p13, %p1633_p11 }
  0xd3   : > { %p1636_p1 = pnand %p1635_p0, %p1631_p10 }
  0xd5   : > { %1639 = shalt.err (!%p1636_p1)  }
  0xd6   : > { %s1640_s8 = scalar_lea.vmem %s2519_s11, 16  ;;  %p1645_p3 = scmp.lt.s32.totalorder %s2519_s11, %s2422_s12 }
  0xd7   : > { %p1641_p2 = scmp.ne.s32.totalorder %s2519_s11, %s1640_s8  ;;  %p1646_p5 = scmp.lt.s32.totalorder %s2425_s19, %s1640_s8 }
  0xd9   : > { %p1647_p6 = por %p1646_p5, %p1645_p3 }
  0xdb   : > { %p1648_p7 = pnand %p1647_p6, %p1641_p2 }
  0xdd   : > { %1651 = shalt.err (!%p1648_p7)  }
  0xde   : > { %358 = dma.hbm_to_vmem [thread:$0]  %s345_s10, 16, %s2519_s11, %s2409_s2 }
  0xdf   : > { %s1258_s28 = sshll.u32 %s2524_s9, 4  ;;  %s391_s26 = sld [smem:[#allocation5 + %s390_s27]] }
  0xe0   : > { %s369_s29 = scalar_lea.hbm %s3048_s1, %s1258_s28  ;;  %s1065_s13 = scalar_lea.vmem %s2390_s30, 9 [#allocation2] }
  0xe1   : > { %s1652_s14 = scalar_lea.hbm %s369_s29, 16  ;;  %p1655_p12 = scmp.lt.s32.totalorder %s369_s29, %s3048_s1 }
  0xe2   : > { %p1653_p9 = scmp.ne.s32.totalorder %s369_s29, %s1652_s14  ;;  %p1656_p10 = scmp.lt.s32.totalorder %s2414_s7, %s1652_s14 }
  0xe4   : > { %p1657_p11 = por %p1656_p10, %p1655_p12 }
  0xe6   : > { %p1658_p13 = pnand %p1657_p11, %p1653_p9 }
  0xe8   : > { %1661 = shalt.err (!%p1658_p13)  }
  0xe9   : > { %s1662_s11 = scalar_lea.vmem %s2542_s4, 16  ;;  %p1667_p1 = scmp.lt.s32.totalorder %s2542_s4, %s2422_s12 }
  0xea   : > { %p1663_p0 = scmp.ne.s32.totalorder %s2542_s4, %s1662_s11  ;;  %p1668_p2 = scmp.lt.s32.totalorder %s2425_s19, %s1662_s11 }
  0xec   : > { %p1669_p3 = por %p1668_p2, %p1667_p1 }
  0xee   : > { %p1670_p5 = pnand %p1669_p3, %p1663_p0 }
  0xf0   : > { %1673 = shalt.err (!%p1670_p5)  }
  0xf1   : > { %382 = dma.hbm_to_vmem [thread:$0]  %s369_s29, 16, %s2542_s4, %s2409_s2 }
  0xf2   : > { %s403_s9 = sshll.u32 %s1065_s13, 4  ;;  %s414_s27 = sadd.s32 10, %s2386_s25  ;;  %s404_s9 = int_to_ptr.vmem [resolvable:$true] %s403_s9 }
  0xf3   : > { %s415_s10 = sld [smem:[#allocation5 + %s414_s27]]  ;;  %s1070_s0 = scalar_lea.vmem %s2390_s30, 10 [#allocation2] }
  0xf4   : > { %s438_s5 = sadd.s32 11, %s2386_s25  ;;  %s1261_s8 = sshll.u32 %s391_s26, 4 }
  0xf5   : > { %s427_s28 = sshll.u32 %s1070_s0, 4  ;;  %s393_s14 = scalar_lea.hbm %s3048_s1, %s1261_s8  ;;  %s2577_s28 = int_to_ptr.vmem [resolvable:$true] %s427_s28 }
  0xf6   : > { %s1674_s6 = scalar_lea.hbm %s393_s14, 16  ;;  %p1677_p7 = scmp.lt.s32.totalorder %s393_s14, %s3048_s1 }
  0xf7   : > { %p1675_p6 = scmp.ne.s32.totalorder %s393_s14, %s1674_s6  ;;  %p1678_p9 = scmp.lt.s32.totalorder %s2414_s7, %s1674_s6 }
  0xf9   : > { %p1679_p12 = por %p1678_p9, %p1677_p7 }
  0xfb   : > { %p1680_p10 = pnand %p1679_p12, %p1675_p6 }
  0xfd   : > { %1683 = shalt.err (!%p1680_p10)  }
  0xfe   : > { %s1684_s4 = scalar_lea.vmem %s404_s9, 16  ;;  %p1689_p13 = scmp.lt.s32.totalorder %s404_s9, %s2422_s12 }
  0xff   : > { %p1685_p11 = scmp.ne.s32.totalorder %s404_s9, %s1684_s4  ;;  %p1690_p0 = scmp.lt.s32.totalorder %s2425_s19, %s1684_s4 }
 0x101   : > { %p1691_p1 = por %p1690_p0, %p1689_p13 }
 0x103   : > { %p1692_p2 = pnand %p1691_p1, %p1685_p11 }
 0x105   : > { %1695 = shalt.err (!%p1692_p2)  }
 0x106   : > { %406 = dma.hbm_to_vmem [thread:$0]  %s393_s14, 16, %s404_s9, %s2409_s2 }
 0x107   : > { %s439_s26 = sld [smem:[#allocation5 + %s438_s5]]  ;;  %s1075_s29 = scalar_lea.vmem %s2390_s30, 11 [#allocation2] }
 0x108   : > { %s1264_s13 = sshll.u32 %s415_s10, 4  ;;  %s451_s27 = sshll.u32 %s1075_s29, 4  ;;  %s2590_s27 = int_to_ptr.vmem [resolvable:$true] %s451_s27 }
 0x109   : > { %s417_s17 = scalar_lea.hbm %s3048_s1, %s1264_s13 }
 0x10a   : > { %s1696_s22 = scalar_lea.hbm %s417_s17, 16  ;;  %p1699_p5 = scmp.lt.s32.totalorder %s417_s17, %s3048_s1 }
 0x10b   : > { %p1697_p3 = scmp.ne.s32.totalorder %s417_s17, %s1696_s22  ;;  %p1700_p6 = scmp.lt.s32.totalorder %s2414_s7, %s1696_s22 }
 0x10d   : > { %p1701_p7 = por %p1700_p6, %p1699_p5 }
 0x10f   : > { %p1702_p9 = pnand %p1701_p7, %p1697_p3 }
 0x111   : > { %1705 = shalt.err (!%p1702_p9)  }
 0x112   : > { %s1706_s9 = scalar_lea.vmem %s2577_s28, 16  ;;  %p1711_p10 = scmp.lt.s32.totalorder %s2577_s28, %s2422_s12 }
 0x113   : > { %p1707_p12 = scmp.ne.s32.totalorder %s2577_s28, %s1706_s9  ;;  %p1712_p11 = scmp.lt.s32.totalorder %s2425_s19, %s1706_s9 }
 0x115   : > { %p1713_p13 = por %p1712_p11, %p1711_p10 }
 0x117   : > { %p1714_p0 = pnand %p1713_p13, %p1707_p12 }
 0x119   : > { %1717 = shalt.err (!%p1714_p0)  }
 0x11a   : > { %430 = dma.hbm_to_vmem [thread:$0]  %s417_s17, 16, %s2577_s28, %s2409_s2 }
 0x11b   : > { %s462_s10 = sadd.s32 12, %s2386_s25  ;;  %s1080_s5 = scalar_lea.vmem %s2390_s30, 12 [#allocation2] }
 0x11c   : > { %s463_s14 = sld [smem:[#allocation5 + %s462_s10]]  ;;  %s475_s11 = sshll.u32 %s1080_s5, 4  ;;  %s2605_s11 = int_to_ptr.vmem [resolvable:$true] %s475_s11 }
 0x11d   : > { %s1267_s4 = sshll.u32 %s439_s26, 4  ;;  %s486_s8 = sadd.s32 13, %s2386_s25 }
 0x11e   : > { %s441_s0 = scalar_lea.hbm %s3048_s1, %s1267_s4 }
 0x11f   : > { %s1718_s22 = scalar_lea.hbm %s441_s0, 16  ;;  %p1721_p2 = scmp.lt.s32.totalorder %s441_s0, %s3048_s1 }
 0x120   : > { %p1719_p1 = scmp.ne.s32.totalorder %s441_s0, %s1718_s22  ;;  %p1722_p3 = scmp.lt.s32.totalorder %s2414_s7, %s1718_s22 }
 0x122   : > { %p1723_p5 = por %p1722_p3, %p1721_p2 }
 0x124   : > { %p1724_p6 = pnand %p1723_p5, %p1719_p1 }
 0x126   : > { %1727 = shalt.err (!%p1724_p6)  }
 0x127   : > { %s1728_s28 = scalar_lea.vmem %s2590_s27, 16  ;;  %p1733_p9 = scmp.lt.s32.totalorder %s2590_s27, %s2422_s12 }
 0x128   : > { %p1729_p7 = scmp.ne.s32.totalorder %s2590_s27, %s1728_s28  ;;  %p1734_p12 = scmp.lt.s32.totalorder %s2425_s19, %s1728_s28 }
 0x12a   : > { %p1735_p10 = por %p1734_p12, %p1733_p9 }
 0x12c   : > { %p1736_p11 = pnand %p1735_p10, %p1729_p7 }
 0x12e   : > { %1739 = shalt.err (!%p1736_p11)  }
 0x12f   : > { %454 = dma.hbm_to_vmem [thread:$0]  %s441_s0, 16, %s2590_s27, %s2409_s2 }
 0x130   : > { %s487_s26 = sld [smem:[#allocation5 + %s486_s8]]  ;;  %s1085_s17 = scalar_lea.vmem %s2390_s30, 13 [#allocation2] }
 0x131   : > { %s499_s9 = sshll.u32 %s1085_s17, 4  ;;  %s510_s10 = sadd.s32 14, %s2386_s25  ;;  %s2624_s9 = int_to_ptr.vmem [resolvable:$true] %s499_s9 }
 0x132   : > { %s1270_s5 = sshll.u32 %s463_s14, 4  ;;  %s2629_s22 = sld [smem:[#allocation5 + %s510_s10]] }
 0x133   : > { %s465_s13 = scalar_lea.hbm %s3048_s1, %s1270_s5 }
 0x134   : > { %s1740_s6 = scalar_lea.hbm %s465_s13, 16  ;;  %p1743_p0 = scmp.lt.s32.totalorder %s465_s13, %s3048_s1 }
 0x135   : > { %p1741_p13 = scmp.ne.s32.totalorder %s465_s13, %s1740_s6  ;;  %p1744_p1 = scmp.lt.s32.totalorder %s2414_s7, %s1740_s6 }
 0x137   : > { %p1745_p2 = por %p1744_p1, %p1743_p0 }
 0x139   : > { %p1746_p3 = pnand %p1745_p2, %p1741_p13 }
 0x13b   : > { %1749 = shalt.err (!%p1746_p3)  }
 0x13c   : > { %s1750_s27 = scalar_lea.vmem %s2605_s11, 16  ;;  %p1755_p6 = scmp.lt.s32.totalorder %s2605_s11, %s2422_s12 }
 0x13d   : > { %p1751_p5 = scmp.ne.s32.totalorder %s2605_s11, %s1750_s27  ;;  %p1756_p7 = scmp.lt.s32.totalorder %s2425_s19, %s1750_s27 }
 0x13f   : > { %p1757_p9 = por %p1756_p7, %p1755_p6 }
 0x141   : > { %p1758_p12 = pnand %p1757_p9, %p1751_p5 }
 0x143   : > { %1761 = shalt.err (!%p1758_p12)  }
 0x144   : > { %478 = dma.hbm_to_vmem [thread:$0]  %s465_s13, 16, %s2605_s11, %s2409_s2 }
 0x145   : > { %s1090_s14 = scalar_lea.vmem %s2390_s30, 14 [#allocation2]  ;;  %s534_s0 = sadd.s32 15, %s2386_s25 }
 0x146   : > { %s1273_s8 = sshll.u32 %s487_s26, 4  ;;  %s523_s17 = sshll.u32 %s1090_s14, 4  ;;  %s2647_s17 = int_to_ptr.vmem [resolvable:$true] %s523_s17 }
 0x147   : > { %s489_s4 = scalar_lea.hbm %s3048_s1, %s1273_s8 }
 0x148   : > { %s1762_s29 = scalar_lea.hbm %s489_s4, 16  ;;  %p1765_p11 = scmp.lt.s32.totalorder %s489_s4, %s3048_s1 }
 0x149   : > { %p1763_p10 = scmp.ne.s32.totalorder %s489_s4, %s1762_s29  ;;  %p1766_p13 = scmp.lt.s32.totalorder %s2414_s7, %s1762_s29 }
 0x14b   : > { %p1767_p0 = por %p1766_p13, %p1765_p11 }
 0x14d   : > { %p1768_p1 = pnand %p1767_p0, %p1763_p10 }
 0x14f   : > { %1771 = shalt.err (!%p1768_p1)  }
 0x150   : > { %s1772_s25 = scalar_lea.vmem %s2624_s9, 16  ;;  %p1777_p3 = scmp.lt.s32.totalorder %s2624_s9, %s2422_s12 }
 0x151   : > { %p1773_p2 = scmp.ne.s32.totalorder %s2624_s9, %s1772_s25  ;;  %p1778_p5 = scmp.lt.s32.totalorder %s2425_s19, %s1772_s25 }
 0x153   : > { %p1779_p6 = por %p1778_p5, %p1777_p3 }
 0x155   : > { %p1780_p7 = pnand %p1779_p6, %p1773_p2 }
 0x157   : > { %1783 = shalt.err (!%p1780_p7)  }
 0x158   : > { %502 = dma.hbm_to_vmem [thread:$0]  %s489_s4, 16, %s2624_s9, %s2409_s2 }
 0x159   : > { %s1276_s11 = sshll.u32 %s2629_s22, 4  ;;  %s535_s26 = sld [smem:[#allocation5 + %s534_s0]] }
 0x15a   : > { %s513_s27 = scalar_lea.hbm %s3048_s1, %s1276_s11  ;;  %s1095_s14 = scalar_lea.vmem %s2390_s30, 15 [#allocation2] }
 0x15b   : > { %s1784_s8 = scalar_lea.hbm %s513_s27, 16  ;;  %p1787_p12 = scmp.lt.s32.totalorder %s513_s27, %s3048_s1 }
 0x15c   : > { %p1785_p9 = scmp.ne.s32.totalorder %s513_s27, %s1784_s8  ;;  %p1788_p10 = scmp.lt.s32.totalorder %s2414_s7, %s1784_s8 }
 0x15e   : > { %p1789_p11 = por %p1788_p10, %p1787_p12 }
 0x160   : > { %p1790_p13 = pnand %p1789_p11, %p1785_p9 }
 0x162   : > { %1793 = shalt.err (!%p1790_p13)  }
 0x163   : > { %s1794_s9 = scalar_lea.vmem %s2647_s17, 16  ;;  %p1799_p1 = scmp.lt.s32.totalorder %s2647_s17, %s2422_s12 }
 0x164   : > { %p1795_p0 = scmp.ne.s32.totalorder %s2647_s17, %s1794_s9  ;;  %p1800_p2 = scmp.lt.s32.totalorder %s2425_s19, %s1794_s9 }
 0x166   : > { %p1801_p3 = por %p1800_p2, %p1799_p1 }
 0x168   : > { %p1802_p5 = pnand %p1801_p3, %p1795_p0 }
 0x16a   : > { %1805 = shalt.err (!%p1802_p5)  }
 0x16b   : > { %526 = dma.hbm_to_vmem [thread:$0]  %s513_s27, 16, %s2647_s17, %s2409_s2 }
 0x16c   : > { %s547_s30 = sshll.u32 %s1095_s14, 4  ;;  %s1279_s22 = sshll.u32 %s535_s26, 4  ;;  %s548_s30 = int_to_ptr.vmem [resolvable:$true] %s547_s30 }
 0x16d   : > { %s537_s29 = scalar_lea.hbm %s3048_s1, %s1279_s22 }
 0x16e   : > { %s1806_s6 = scalar_lea.hbm %s537_s29, 16  ;;  %p1809_p7 = scmp.lt.s32.totalorder %s537_s29, %s3048_s1 }
 0x16f   : > { %p1807_p6 = scmp.ne.s32.totalorder %s537_s29, %s1806_s6  ;;  %p1810_p9 = scmp.lt.s32.totalorder %s2414_s7, %s1806_s6 }
 0x171   : > { %p1811_p12 = por %p1810_p9, %p1809_p7 }
 0x173   : > { %p1812_p10 = pnand %p1811_p12, %p1807_p6 }
 0x175   : > { %1815 = shalt.err (!%p1812_p10)  }
 0x176   : > { %s1816_s11 = scalar_lea.vmem %s548_s30, 16  ;;  %p1821_p13 = scmp.lt.s32.totalorder %s548_s30, %s2422_s12 }
 0x177   : > { %p1817_p11 = scmp.ne.s32.totalorder %s548_s30, %s1816_s11  ;;  %p1822_p0 = scmp.lt.s32.totalorder %s2425_s19, %s1816_s11 }
 0x179   : > { %p1823_p1 = por %p1822_p0, %p1821_p13 }
 0x17b   : > { %p1824_p2 = pnand %p1823_p1, %p1817_p11 }
 0x17d   : > { %1827 = shalt.err (!%p1824_p2)  }
 0x17e   : > { %550 = dma.hbm_to_vmem [thread:$0]  %s537_s29, 16, %s548_s30, %s2409_s2 }
 0x17f PF: > { %s551_s17 = sadd.s32 1, %s2256_s18 }
 0x180   : > { %p1281_p3 = scmp.ge.s32.totalorder %s551_s17, 2 }
 0x181   : > { %s556_s7 = ssub.s32 (!%p1281_p3), 1, %s3083_s21  ;;  %s1338_s26 = sshll.u32 (!%p1281_p3), %s2256_s18, 7 }
 0x182   : > { %555 = sbr.rel (%p1281_p3) target bundleno = 715 (0x2cb), region = 100  ;;  %s2689_s13 = sadd.s32 (!%p1281_p3), 128, %s1338_s26 }
 0x183   : > { %s1284_s12 = sshll.u32 (!%p1281_p3), %s556_s7, 4  ;;  %s564_s19 = sld [smem:[#allocation5 + %s2689_s13]] (!%p1281_p3) }
 0x184   : > { %s2692_s28 = scalar_lea.vmem (!%p1281_p3), [#allocation2], %s1284_s12  ;;  %s588_s27 = sadd.s32 (!%p1281_p3), 1, %s2689_s13 }
 0x185   : > { %s577_s2 = sshll.u32 (!%p1281_p3), %s2692_s28, 4  ;;  %s2698_s14 = sld [smem:[#allocation5 + %s588_s27]] (!%p1281_p3)  ;;  %s2695_s2 = int_to_ptr.vmem [resolvable:$true] %s577_s2 }
 0x186   : > { %s1105_s8 = scalar_lea.vmem (!%p1281_p3), %s2692_s28, 1 [#allocation2]  ;;  %s612_s5 = sadd.s32 (!%p1281_p3), 2, %s2689_s13 }
 0x187   : > { %s601_s10 = sshll.u32 %s1105_s8, 4  ;;  %s2704_s9 = sld [smem:[#allocation5 + %s612_s5]]  ;;  %s2702_s10 = int_to_ptr.vmem [resolvable:$true] %s601_s10 }
 0x188   : > { %s1110_s22 = scalar_lea.vmem %s2692_s28, 2 [#allocation2]  ;;  %s2710_s15 = scalar_lea.sflag [#allocation3], %s556_s7 }
 0x189   : > { %s1283_s30 = sshll.u32 %s564_s19, 4  ;;  %s625_s6 = sshll.u32 %s1110_s22, 4  ;;  %s2734_s6 = int_to_ptr.vmem [resolvable:$true] %s625_s6 }
 0x18a   : > { %s566_s29 = scalar_lea.hbm %s3048_s1, %s1283_s30  ;;  %s2715_s26 = scalar_lea.hbm %s3048_s1, 8192 }
 0x18b   : > { %s1828_s25 = scalar_lea.hbm %s566_s29, 16  ;;  %p1831_p6 = scmp.lt.s32.totalorder %s566_s29, %s3048_s1 }
 0x18c   : > { %p1829_p5 = scmp.ne.s32.totalorder %s566_s29, %s1828_s25  ;;  %p1832_p7 = scmp.lt.s32.totalorder %s2715_s26, %s1828_s25 }
 0x18e   : > { %p1833_p9 = por %p1832_p7, %p1831_p6 }
 0x190   : > { %p1834_p12 = pnand %p1833_p9, %p1829_p5 }
 0x192   : > { %1837 = shalt.err (!%p1834_p12)  }
 0x193   : > { %s1838_s7 = scalar_lea.vmem %s2695_s2, 16  ;;  %s2271_s19 = smov [#allocation2]  }
 0x194   : > { %p1839_p10 = scmp.ne.s32.totalorder %s2695_s2, %s1838_s7  ;;  %s1840_s8 = sshll.u32 %s2271_s19, 4  ;;  %s2723_s8 = int_to_ptr.vmem [resolvable:$false] %s1840_s8 }
 0x195   : > { %s2726_s5 = scalar_lea.vmem %s2723_s8, 512  ;;  %p1843_p11 = scmp.lt.s32.totalorder %s2695_s2, %s2723_s8 }
 0x196   : > { %p1844_p13 = scmp.lt.s32.totalorder %s2726_s5, %s1838_s7 }
 0x198   : > { %p1845_p0 = por %p1844_p13, %p1843_p11 }
 0x19a   : > { %p1846_p1 = pnand %p1845_p0, %p1839_p10 }
 0x19c   : > { %1849 = shalt.err (!%p1846_p1)  }
 0x19d   : > { %580 = dma.hbm_to_vmem [thread:$0]  %s566_s29, 16, %s2695_s2, %s2710_s15 }
 0x19e   : > { %s1286_s30 = sshll.u32 %s2698_s14, 4  ;;  %s636_s25 = sadd.s32 3, %s2689_s13 }
 0x19f   : > { %s591_s4 = scalar_lea.hbm %s3048_s1, %s1286_s30 }
 0x1a0   : > { %s1850_s11 = scalar_lea.hbm %s591_s4, 16  ;;  %p1853_p3 = scmp.lt.s32.totalorder %s591_s4, %s3048_s1 }
 0x1a1   : > { %p1851_p2 = scmp.ne.s32.totalorder %s591_s4, %s1850_s11  ;;  %p1854_p5 = scmp.lt.s32.totalorder %s2715_s26, %s1850_s11 }
 0x1a3   : > { %p1855_p6 = por %p1854_p5, %p1853_p3 }
 0x1a5   : > { %p1856_p7 = pnand %p1855_p6, %p1851_p2 }
 0x1a7   : > { %1859 = shalt.err (!%p1856_p7)  }
 0x1a8   : > { %s1860_s2 = scalar_lea.vmem %s2702_s10, 16  ;;  %p1865_p12 = scmp.lt.s32.totalorder %s2702_s10, %s2723_s8 }
 0x1a9   : > { %p1861_p9 = scmp.ne.s32.totalorder %s2702_s10, %s1860_s2  ;;  %p1866_p10 = scmp.lt.s32.totalorder %s2726_s5, %s1860_s2 }
 0x1ab   : > { %p1867_p11 = por %p1866_p10, %p1865_p12 }
 0x1ad   : > { %p1868_p13 = pnand %p1867_p11, %p1861_p9 }
 0x1af   : > { %1871 = shalt.err (!%p1868_p13)  }
 0x1b0   : > { %604 = dma.hbm_to_vmem [thread:$0]  %s591_s4, 16, %s2702_s10, %s2710_s15 }
 0x1b1   : > { %s1289_s14 = sshll.u32 %s2704_s9, 4  ;;  %s637_s29 = sld [smem:[#allocation5 + %s636_s25]] }
 0x1b2   : > { %s615_s19 = scalar_lea.hbm %s3048_s1, %s1289_s14  ;;  %s1115_s30 = scalar_lea.vmem %s2692_s28, 3 [#allocation2] }
 0x1b3   : > { %s1872_s22 = scalar_lea.hbm %s615_s19, 16  ;;  %p1875_p1 = scmp.lt.s32.totalorder %s615_s19, %s3048_s1 }
 0x1b4   : > { %p1873_p0 = scmp.ne.s32.totalorder %s615_s19, %s1872_s22  ;;  %p1876_p2 = scmp.lt.s32.totalorder %s2715_s26, %s1872_s22 }
 0x1b6   : > { %p1877_p3 = por %p1876_p2, %p1875_p1 }
 0x1b8   : > { %p1878_p5 = pnand %p1877_p3, %p1873_p0 }
 0x1ba   : > { %1881 = shalt.err (!%p1878_p5)  }
 0x1bb   : > { %s1882_s10 = scalar_lea.vmem %s2734_s6, 16  ;;  %p1887_p7 = scmp.lt.s32.totalorder %s2734_s6, %s2723_s8 }
 0x1bc   : > { %p1883_p6 = scmp.ne.s32.totalorder %s2734_s6, %s1882_s10  ;;  %p1888_p9 = scmp.lt.s32.totalorder %s2726_s5, %s1882_s10 }
 0x1be   : > { %p1889_p12 = por %p1888_p9, %p1887_p7 }
 0x1c0   : > { %p1890_p10 = pnand %p1889_p12, %p1883_p6 }
 0x1c2   : > { %1893 = shalt.err (!%p1890_p10)  }
 0x1c3   : > { %628 = dma.hbm_to_vmem [thread:$0]  %s615_s19, 16, %s2734_s6, %s2710_s15 }
 0x1c4   : > { %s649_s9 = sshll.u32 %s1115_s30, 4  ;;  %s660_s4 = sadd.s32 4, %s2689_s13  ;;  %s650_s9 = int_to_ptr.vmem [resolvable:$true] %s649_s9 }
 0x1c5   : > { %s661_s25 = sld [smem:[#allocation5 + %s660_s4]]  ;;  %s1120_s17 = scalar_lea.vmem %s2692_s28, 4 [#allocation2] }
 0x1c6   : > { %s684_s12 = sadd.s32 5, %s2689_s13  ;;  %s1292_s2 = sshll.u32 %s637_s29, 4 }
 0x1c7   : > { %s673_s14 = sshll.u32 %s1120_s17, 4  ;;  %s639_s22 = scalar_lea.hbm %s3048_s1, %s1292_s2  ;;  %s2773_s14 = int_to_ptr.vmem [resolvable:$true] %s673_s14 }
 0x1c8   : > { %s1894_s0 = scalar_lea.hbm %s639_s22, 16  ;;  %p1897_p13 = scmp.lt.s32.totalorder %s639_s22, %s3048_s1 }
 0x1c9   : > { %p1895_p11 = scmp.ne.s32.totalorder %s639_s22, %s1894_s0  ;;  %p1898_p0 = scmp.lt.s32.totalorder %s2715_s26, %s1894_s0 }
 0x1cb   : > { %p1899_p1 = por %p1898_p0, %p1897_p13 }
 0x1cd   : > { %p1900_p2 = pnand %p1899_p1, %p1895_p11 }
 0x1cf   : > { %1903 = shalt.err (!%p1900_p2)  }
 0x1d0   : > { %s1904_s6 = scalar_lea.vmem %s650_s9, 16  ;;  %p1909_p5 = scmp.lt.s32.totalorder %s650_s9, %s2723_s8 }
 0x1d1   : > { %p1905_p3 = scmp.ne.s32.totalorder %s650_s9, %s1904_s6  ;;  %p1910_p6 = scmp.lt.s32.totalorder %s2726_s5, %s1904_s6 }
 0x1d3   : > { %p1911_p7 = por %p1910_p6, %p1909_p5 }
 0x1d5   : > { %p1912_p9 = pnand %p1911_p7, %p1905_p3 }
 0x1d7   : > { %1915 = shalt.err (!%p1912_p9)  }
 0x1d8   : > { %652 = dma.hbm_to_vmem [thread:$0]  %s639_s22, 16, %s650_s9, %s2710_s15 }
 0x1d9   : > { %s685_s29 = sld [smem:[#allocation5 + %s684_s12]]  ;;  %s1125_s19 = scalar_lea.vmem %s2692_s28, 5 [#allocation2] }
 0x1da   : > { %s1295_s30 = sshll.u32 %s661_s25, 4  ;;  %s697_s4 = sshll.u32 %s1125_s19, 4  ;;  %s2786_s4 = int_to_ptr.vmem [resolvable:$true] %s697_s4 }
 0x1db   : > { %s663_s27 = scalar_lea.hbm %s3048_s1, %s1295_s30 }
 0x1dc   : > { %s1916_s7 = scalar_lea.hbm %s663_s27, 16  ;;  %p1919_p10 = scmp.lt.s32.totalorder %s663_s27, %s3048_s1 }
 0x1dd   : > { %p1917_p12 = scmp.ne.s32.totalorder %s663_s27, %s1916_s7  ;;  %p1920_p11 = scmp.lt.s32.totalorder %s2715_s26, %s1916_s7 }
 0x1df   : > { %p1921_p13 = por %p1920_p11, %p1919_p10 }
 0x1e1   : > { %p1922_p0 = pnand %p1921_p13, %p1917_p12 }
 0x1e3   : > { %1925 = shalt.err (!%p1922_p0)  }
 0x1e4   : > { %s1926_s9 = scalar_lea.vmem %s2773_s14, 16  ;;  %p1931_p2 = scmp.lt.s32.totalorder %s2773_s14, %s2723_s8 }
 0x1e5   : > { %p1927_p1 = scmp.ne.s32.totalorder %s2773_s14, %s1926_s9  ;;  %p1932_p3 = scmp.lt.s32.totalorder %s2726_s5, %s1926_s9 }
 0x1e7   : > { %p1933_p5 = por %p1932_p3, %p1931_p2 }
 0x1e9   : > { %p1934_p6 = pnand %p1933_p5, %p1927_p1 }
 0x1eb   : > { %1937 = shalt.err (!%p1934_p6)  }
 0x1ec   : > { %676 = dma.hbm_to_vmem [thread:$0]  %s663_s27, 16, %s2773_s14, %s2710_s15 }
 0x1ed   : > { %s708_s25 = sadd.s32 6, %s2689_s13  ;;  %s1130_s12 = scalar_lea.vmem %s2692_s28, 6 [#allocation2] }
 0x1ee   : > { %s709_s22 = sld [smem:[#allocation5 + %s708_s25]]  ;;  %s721_s10 = sshll.u32 %s1130_s12, 4  ;;  %s2801_s10 = int_to_ptr.vmem [resolvable:$true] %s721_s10 }
 0x1ef   : > { %s1298_s6 = sshll.u32 %s685_s29, 4  ;;  %s732_s2 = sadd.s32 7, %s2689_s13 }
 0x1f0   : > { %s687_s17 = scalar_lea.hbm %s3048_s1, %s1298_s6 }
 0x1f1   : > { %s1938_s7 = scalar_lea.hbm %s687_s17, 16  ;;  %p1941_p9 = scmp.lt.s32.totalorder %s687_s17, %s3048_s1 }
 0x1f2   : > { %p1939_p7 = scmp.ne.s32.totalorder %s687_s17, %s1938_s7  ;;  %p1942_p12 = scmp.lt.s32.totalorder %s2715_s26, %s1938_s7 }
 0x1f4   : > { %p1943_p10 = por %p1942_p12, %p1941_p9 }
 0x1f6   : > { %p1944_p11 = pnand %p1943_p10, %p1939_p7 }
 0x1f8   : > { %1947 = shalt.err (!%p1944_p11)  }
 0x1f9   : > { %s1948_s14 = scalar_lea.vmem %s2786_s4, 16  ;;  %p1953_p0 = scmp.lt.s32.totalorder %s2786_s4, %s2723_s8 }
 0x1fa   : > { %p1949_p13 = scmp.ne.s32.totalorder %s2786_s4, %s1948_s14  ;;  %p1954_p1 = scmp.lt.s32.totalorder %s2726_s5, %s1948_s14 }
 0x1fc   : > { %p1955_p2 = por %p1954_p1, %p1953_p0 }
 0x1fe   : > { %p1956_p3 = pnand %p1955_p2, %p1949_p13 }
 0x200   : > { %1959 = shalt.err (!%p1956_p3)  }
 0x201   : > { %700 = dma.hbm_to_vmem [thread:$0]  %s687_s17, 16, %s2786_s4, %s2710_s15 }
 0x202   : > { %s733_s29 = sld [smem:[#allocation5 + %s732_s2]]  ;;  %s1135_s27 = scalar_lea.vmem %s2692_s28, 7 [#allocation2] }
 0x203   : > { %s745_s9 = sshll.u32 %s1135_s27, 4  ;;  %s756_s25 = sadd.s32 8, %s2689_s13  ;;  %s2820_s9 = int_to_ptr.vmem [resolvable:$true] %s745_s9 }
 0x204   : > { %s1301_s12 = sshll.u32 %s709_s22, 4  ;;  %s2825_s7 = sld [smem:[#allocation5 + %s756_s25]] }
 0x205   : > { %s711_s30 = scalar_lea.hbm %s3048_s1, %s1301_s12 }
 0x206   : > { %s1960_s0 = scalar_lea.hbm %s711_s30, 16  ;;  %p1963_p6 = scmp.lt.s32.totalorder %s711_s30, %s3048_s1 }
 0x207   : > { %p1961_p5 = scmp.ne.s32.totalorder %s711_s30, %s1960_s0  ;;  %p1964_p7 = scmp.lt.s32.totalorder %s2715_s26, %s1960_s0 }
 0x209   : > { %p1965_p9 = por %p1964_p7, %p1963_p6 }
 0x20b   : > { %p1966_p12 = pnand %p1965_p9, %p1961_p5 }
 0x20d   : > { %1969 = shalt.err (!%p1966_p12)  }
 0x20e   : > { %s1970_s4 = scalar_lea.vmem %s2801_s10, 16  ;;  %p1975_p11 = scmp.lt.s32.totalorder %s2801_s10, %s2723_s8 }
 0x20f   : > { %p1971_p10 = scmp.ne.s32.totalorder %s2801_s10, %s1970_s4  ;;  %p1976_p13 = scmp.lt.s32.totalorder %s2726_s5, %s1970_s4 }
 0x211   : > { %p1977_p0 = por %p1976_p13, %p1975_p11 }
 0x213   : > { %p1978_p1 = pnand %p1977_p0, %p1971_p10 }
 0x215   : > { %1981 = shalt.err (!%p1978_p1)  }
 0x216   : > { %724 = dma.hbm_to_vmem [thread:$0]  %s711_s30, 16, %s2801_s10, %s2710_s15 }
 0x217   : > { %s1140_s22 = scalar_lea.vmem %s2692_s28, 8 [#allocation2]  ;;  %s780_s17 = sadd.s32 9, %s2689_s13 }
 0x218   : > { %s1304_s2 = sshll.u32 %s733_s29, 4  ;;  %s769_s27 = sshll.u32 %s1140_s22, 4  ;;  %s2843_s27 = int_to_ptr.vmem [resolvable:$true] %s769_s27 }
 0x219   : > { %s735_s6 = scalar_lea.hbm %s3048_s1, %s1304_s2 }
 0x21a   : > { %s1982_s19 = scalar_lea.hbm %s735_s6, 16  ;;  %p1985_p3 = scmp.lt.s32.totalorder %s735_s6, %s3048_s1 }
 0x21b   : > { %p1983_p2 = scmp.ne.s32.totalorder %s735_s6, %s1982_s19  ;;  %p1986_p5 = scmp.lt.s32.totalorder %s2715_s26, %s1982_s19 }
 0x21d   : > { %p1987_p6 = por %p1986_p5, %p1985_p3 }
 0x21f   : > { %p1988_p7 = pnand %p1987_p6, %p1983_p2 }
 0x221   : > { %1991 = shalt.err (!%p1988_p7)  }
 0x222   : > { %s1992_s10 = scalar_lea.vmem %s2820_s9, 16  ;;  %p1997_p12 = scmp.lt.s32.totalorder %s2820_s9, %s2723_s8 }
 0x223   : > { %p1993_p9 = scmp.ne.s32.totalorder %s2820_s9, %s1992_s10  ;;  %p1998_p10 = scmp.lt.s32.totalorder %s2726_s5, %s1992_s10 }
 0x225   : > { %p1999_p11 = por %p1998_p10, %p1997_p12 }
 0x227   : > { %p2000_p13 = pnand %p1999_p11, %p1993_p9 }
 0x229   : > { %2003 = shalt.err (!%p2000_p13)  }
 0x22a   : > { %748 = dma.hbm_to_vmem [thread:$0]  %s735_s6, 16, %s2820_s9, %s2710_s15 }
 0x22b   : > { %s1307_s29 = sshll.u32 %s2825_s7, 4  ;;  %s781_s30 = sld [smem:[#allocation5 + %s780_s17]] }
 0x22c   : > { %s759_s22 = scalar_lea.hbm %s3048_s1, %s1307_s29  ;;  %s1145_s2 = scalar_lea.vmem %s2692_s28, 9 [#allocation2] }
 0x22d   : > { %s2004_s25 = scalar_lea.hbm %s759_s22, 16  ;;  %p2007_p1 = scmp.lt.s32.totalorder %s759_s22, %s3048_s1 }
 0x22e   : > { %p2005_p0 = scmp.ne.s32.totalorder %s759_s22, %s2004_s25  ;;  %p2008_p2 = scmp.lt.s32.totalorder %s2715_s26, %s2004_s25 }
 0x230   : > { %p2009_p3 = por %p2008_p2, %p2007_p1 }
 0x232   : > { %p2010_p5 = pnand %p2009_p3, %p2005_p0 }
 0x234   : > { %2013 = shalt.err (!%p2010_p5)  }
 0x235   : > { %s2014_s9 = scalar_lea.vmem %s2843_s27, 16  ;;  %p2019_p7 = scmp.lt.s32.totalorder %s2843_s27, %s2723_s8 }
 0x236   : > { %p2015_p6 = scmp.ne.s32.totalorder %s2843_s27, %s2014_s9  ;;  %p2020_p9 = scmp.lt.s32.totalorder %s2726_s5, %s2014_s9 }
 0x238   : > { %p2021_p12 = por %p2020_p9, %p2019_p7 }
 0x23a   : > { %p2022_p10 = pnand %p2021_p12, %p2015_p6 }
 0x23c   : > { %2025 = shalt.err (!%p2022_p10)  }
 0x23d   : > { %772 = dma.hbm_to_vmem [thread:$0]  %s759_s22, 16, %s2843_s27, %s2710_s15 }
 0x23e   : > { %s793_s7 = sshll.u32 %s1145_s2, 4  ;;  %s804_s17 = sadd.s32 10, %s2689_s13  ;;  %s794_s7 = int_to_ptr.vmem [resolvable:$true] %s793_s7 }
 0x23f   : > { %s805_s6 = sld [smem:[#allocation5 + %s804_s17]]  ;;  %s1150_s0 = scalar_lea.vmem %s2692_s28, 10 [#allocation2] }
 0x240   : > { %s828_s11 = sadd.s32 11, %s2689_s13  ;;  %s1310_s10 = sshll.u32 %s781_s30, 4 }
 0x241   : > { %s817_s29 = sshll.u32 %s1150_s0, 4  ;;  %s783_s25 = scalar_lea.hbm %s3048_s1, %s1310_s10  ;;  %s2878_s29 = int_to_ptr.vmem [resolvable:$true] %s817_s29 }
 0x242   : > { %s2026_s12 = scalar_lea.hbm %s783_s25, 16  ;;  %p2029_p13 = scmp.lt.s32.totalorder %s783_s25, %s3048_s1 }
 0x243   : > { %p2027_p11 = scmp.ne.s32.totalorder %s783_s25, %s2026_s12  ;;  %p2030_p0 = scmp.lt.s32.totalorder %s2715_s26, %s2026_s12 }
 0x245   : > { %p2031_p1 = por %p2030_p0, %p2029_p13 }
 0x247   : > { %p2032_p2 = pnand %p2031_p1, %p2027_p11 }
 0x249   : > { %2035 = shalt.err (!%p2032_p2)  }
 0x24a   : > { %s2036_s27 = scalar_lea.vmem %s794_s7, 16  ;;  %p2041_p5 = scmp.lt.s32.totalorder %s794_s7, %s2723_s8 }
 0x24b   : > { %p2037_p3 = scmp.ne.s32.totalorder %s794_s7, %s2036_s27  ;;  %p2042_p6 = scmp.lt.s32.totalorder %s2726_s5, %s2036_s27 }
 0x24d   : > { %p2043_p7 = por %p2042_p6, %p2041_p5 }
 0x24f   : > { %p2044_p9 = pnand %p2043_p7, %p2037_p3 }
 0x251   : > { %2047 = shalt.err (!%p2044_p9)  }
 0x252   : > { %796 = dma.hbm_to_vmem [thread:$0]  %s783_s25, 16, %s794_s7, %s2710_s15 }
 0x253   : > { %s829_s30 = sld [smem:[#allocation5 + %s828_s11]]  ;;  %s1155_s22 = scalar_lea.vmem %s2692_s28, 11 [#allocation2] }
 0x254   : > { %s1313_s2 = sshll.u32 %s805_s6, 4  ;;  %s841_s17 = sshll.u32 %s1155_s22, 4  ;;  %s2891_s17 = int_to_ptr.vmem [resolvable:$true] %s841_s17 }
 0x255   : > { %s807_s14 = scalar_lea.hbm %s3048_s1, %s1313_s2 }
 0x256   : > { %s2048_s4 = scalar_lea.hbm %s807_s14, 16  ;;  %p2051_p10 = scmp.lt.s32.totalorder %s807_s14, %s3048_s1 }
 0x257   : > { %p2049_p12 = scmp.ne.s32.totalorder %s807_s14, %s2048_s4  ;;  %p2052_p11 = scmp.lt.s32.totalorder %s2715_s26, %s2048_s4 }
 0x259   : > { %p2053_p13 = por %p2052_p11, %p2051_p10 }
 0x25b   : > { %p2054_p0 = pnand %p2053_p13, %p2049_p12 }
 0x25d   : > { %2057 = shalt.err (!%p2054_p0)  }
 0x25e   : > { %s2058_s7 = scalar_lea.vmem %s2878_s29, 16  ;;  %p2063_p2 = scmp.lt.s32.totalorder %s2878_s29, %s2723_s8 }
 0x25f   : > { %p2059_p1 = scmp.ne.s32.totalorder %s2878_s29, %s2058_s7  ;;  %p2064_p3 = scmp.lt.s32.totalorder %s2726_s5, %s2058_s7 }
 0x261   : > { %p2065_p5 = por %p2064_p3, %p2063_p2 }
 0x263   : > { %p2066_p6 = pnand %p2065_p5, %p2059_p1 }
 0x265   : > { %2069 = shalt.err (!%p2066_p6)  }
 0x266   : > { %820 = dma.hbm_to_vmem [thread:$0]  %s807_s14, 16, %s2878_s29, %s2710_s15 }
 0x267   : > { %s852_s6 = sadd.s32 12, %s2689_s13  ;;  %s1160_s11 = scalar_lea.vmem %s2692_s28, 12 [#allocation2] }
 0x268   : > { %s853_s25 = sld [smem:[#allocation5 + %s852_s6]]  ;;  %s865_s9 = sshll.u32 %s1160_s11, 4  ;;  %s2906_s9 = int_to_ptr.vmem [resolvable:$true] %s865_s9 }
 0x269   : > { %s1316_s27 = sshll.u32 %s829_s30, 4  ;;  %s876_s10 = sadd.s32 13, %s2689_s13 }
 0x26a   : > { %s831_s0 = scalar_lea.hbm %s3048_s1, %s1316_s27 }
 0x26b   : > { %s2070_s4 = scalar_lea.hbm %s831_s0, 16  ;;  %p2073_p9 = scmp.lt.s32.totalorder %s831_s0, %s3048_s1 }
 0x26c   : > { %p2071_p7 = scmp.ne.s32.totalorder %s831_s0, %s2070_s4  ;;  %p2074_p12 = scmp.lt.s32.totalorder %s2715_s26, %s2070_s4 }
 0x26e   : > { %p2075_p10 = por %p2074_p12, %p2073_p9 }
 0x270   : > { %p2076_p11 = pnand %p2075_p10, %p2071_p7 }
 0x272   : > { %2079 = shalt.err (!%p2076_p11)  }
 0x273   : > { %s2080_s29 = scalar_lea.vmem %s2891_s17, 16  ;;  %p2085_p0 = scmp.lt.s32.totalorder %s2891_s17, %s2723_s8 }
 0x274   : > { %p2081_p13 = scmp.ne.s32.totalorder %s2891_s17, %s2080_s29  ;;  %p2086_p1 = scmp.lt.s32.totalorder %s2726_s5, %s2080_s29 }
 0x276   : > { %p2087_p2 = por %p2086_p1, %p2085_p0 }
 0x278   : > { %p2088_p3 = pnand %p2087_p2, %p2081_p13 }
 0x27a   : > { %2091 = shalt.err (!%p2088_p3)  }
 0x27b   : > { %844 = dma.hbm_to_vmem [thread:$0]  %s831_s0, 16, %s2891_s17, %s2710_s15 }
 0x27c   : > { %s877_s30 = sld [smem:[#allocation5 + %s876_s10]]  ;;  %s1165_s14 = scalar_lea.vmem %s2692_s28, 13 [#allocation2] }
 0x27d   : > { %s889_s7 = sshll.u32 %s1165_s14, 4  ;;  %s900_s6 = sadd.s32 14, %s2689_s13  ;;  %s2925_s7 = int_to_ptr.vmem [resolvable:$true] %s889_s7 }
 0x27e   : > { %s1319_s11 = sshll.u32 %s853_s25, 4  ;;  %s2930_s4 = sld [smem:[#allocation5 + %s900_s6]] }
 0x27f   : > { %s855_s2 = scalar_lea.hbm %s3048_s1, %s1319_s11 }
 0x280   : > { %s2092_s12 = scalar_lea.hbm %s855_s2, 16  ;;  %p2095_p6 = scmp.lt.s32.totalorder %s855_s2, %s3048_s1 }
 0x281   : > { %p2093_p5 = scmp.ne.s32.totalorder %s855_s2, %s2092_s12  ;;  %p2096_p7 = scmp.lt.s32.totalorder %s2715_s26, %s2092_s12 }
 0x283   : > { %p2097_p9 = por %p2096_p7, %p2095_p6 }
 0x285   : > { %p2098_p12 = pnand %p2097_p9, %p2093_p5 }
 0x287   : > { %2101 = shalt.err (!%p2098_p12)  }
 0x288   : > { %s2102_s17 = scalar_lea.vmem %s2906_s9, 16  ;;  %p2107_p11 = scmp.lt.s32.totalorder %s2906_s9, %s2723_s8 }
 0x289   : > { %p2103_p10 = scmp.ne.s32.totalorder %s2906_s9, %s2102_s17  ;;  %p2108_p13 = scmp.lt.s32.totalorder %s2726_s5, %s2102_s17 }
 0x28b   : > { %p2109_p0 = por %p2108_p13, %p2107_p11 }
 0x28d   : > { %p2110_p1 = pnand %p2109_p0, %p2103_p10 }
 0x28f   : > { %2113 = shalt.err (!%p2110_p1)  }
 0x290   : > { %868 = dma.hbm_to_vmem [thread:$0]  %s855_s2, 16, %s2906_s9, %s2710_s15 }
 0x291   : > { %s1170_s25 = scalar_lea.vmem %s2692_s28, 14 [#allocation2]  ;;  %s924_s0 = sadd.s32 15, %s2689_s13 }
 0x292   : > { %s1322_s10 = sshll.u32 %s877_s30, 4  ;;  %s913_s14 = sshll.u32 %s1170_s25, 4  ;;  %s2948_s14 = int_to_ptr.vmem [resolvable:$true] %s913_s14 }
 0x293   : > { %s879_s27 = scalar_lea.hbm %s3048_s1, %s1322_s10 }
 0x294   : > { %s2114_s22 = scalar_lea.hbm %s879_s27, 16  ;;  %p2117_p3 = scmp.lt.s32.totalorder %s879_s27, %s3048_s1 }
 0x295   : > { %p2115_p2 = scmp.ne.s32.totalorder %s879_s27, %s2114_s22  ;;  %p2118_p5 = scmp.lt.s32.totalorder %s2715_s26, %s2114_s22 }
 0x297   : > { %p2119_p6 = por %p2118_p5, %p2117_p3 }
 0x299   : > { %p2120_p7 = pnand %p2119_p6, %p2115_p2 }
 0x29b   : > { %2123 = shalt.err (!%p2120_p7)  }
 0x29c   : > { %s2124_s13 = scalar_lea.vmem %s2925_s7, 16  ;;  %p2129_p12 = scmp.lt.s32.totalorder %s2925_s7, %s2723_s8 }
 0x29d   : > { %p2125_p9 = scmp.ne.s32.totalorder %s2925_s7, %s2124_s13  ;;  %p2130_p10 = scmp.lt.s32.totalorder %s2726_s5, %s2124_s13 }
 0x29f   : > { %p2131_p11 = por %p2130_p10, %p2129_p12 }
 0x2a1   : > { %p2132_p13 = pnand %p2131_p11, %p2125_p9 }
 0x2a3   : > { %2135 = shalt.err (!%p2132_p13)  }
 0x2a4   : > { %892 = dma.hbm_to_vmem [thread:$0]  %s879_s27, 16, %s2925_s7, %s2710_s15 }
 0x2a5   : > { %s1325_s9 = sshll.u32 %s2930_s4, 4  ;;  %s925_s30 = sld [smem:[#allocation5 + %s924_s0]] }
 0x2a6   : > { %s903_s17 = scalar_lea.hbm %s3048_s1, %s1325_s9  ;;  %s1175_s25 = scalar_lea.vmem %s2692_s28, 15 [#allocation2] }
 0x2a7   : > { %s2136_s10 = scalar_lea.hbm %s903_s17, 16  ;;  %p2139_p1 = scmp.lt.s32.totalorder %s903_s17, %s3048_s1 }
 0x2a8   : > { %p2137_p0 = scmp.ne.s32.totalorder %s903_s17, %s2136_s10  ;;  %p2140_p2 = scmp.lt.s32.totalorder %s2715_s26, %s2136_s10 }
 0x2aa   : > { %p2141_p3 = por %p2140_p2, %p2139_p1 }
 0x2ac   : > { %p2142_p5 = pnand %p2141_p3, %p2137_p0 }
 0x2ae   : > { %2145 = shalt.err (!%p2142_p5)  }
 0x2af   : > { %s2146_s7 = scalar_lea.vmem %s2948_s14, 16  ;;  %p2151_p7 = scmp.lt.s32.totalorder %s2948_s14, %s2723_s8 }
 0x2b0   : > { %p2147_p6 = scmp.ne.s32.totalorder %s2948_s14, %s2146_s7  ;;  %p2152_p9 = scmp.lt.s32.totalorder %s2726_s5, %s2146_s7 }
 0x2b2   : > { %p2153_p12 = por %p2152_p9, %p2151_p7 }
 0x2b4   : > { %p2154_p10 = pnand %p2153_p12, %p2147_p6 }
 0x2b6   : > { %2157 = shalt.err (!%p2154_p10)  }
 0x2b7   : > { %916 = dma.hbm_to_vmem [thread:$0]  %s903_s17, 16, %s2948_s14, %s2710_s15 }
 0x2b8   : > { %s937_s28 = sshll.u32 %s1175_s25, 4  ;;  %s1328_s4 = sshll.u32 %s925_s30, 4  ;;  %s938_s28 = int_to_ptr.vmem [resolvable:$true] %s937_s28 }
 0x2b9   : > { %s927_s22 = scalar_lea.hbm %s3048_s1, %s1328_s4 }
 0x2ba   : > { %s2158_s12 = scalar_lea.hbm %s927_s22, 16  ;;  %p2161_p13 = scmp.lt.s32.totalorder %s927_s22, %s3048_s1 }
 0x2bb   : > { %p2159_p11 = scmp.ne.s32.totalorder %s927_s22, %s2158_s12  ;;  %p2162_p0 = scmp.lt.s32.totalorder %s2715_s26, %s2158_s12 }
 0x2bd   : > { %p2163_p1 = por %p2162_p0, %p2161_p13 }
 0x2bf   : > { %p2164_p2 = pnand %p2163_p1, %p2159_p11 }
 0x2c1   : > { %2167 = shalt.err (!%p2164_p2)  }
 0x2c2   : > { %s2168_s9 = scalar_lea.vmem %s938_s28, 16  ;;  %p2173_p5 = scmp.lt.s32.totalorder %s938_s28, %s2723_s8 }
 0x2c3   : > { %p2169_p3 = scmp.ne.s32.totalorder %s938_s28, %s2168_s9  ;;  %p2174_p6 = scmp.lt.s32.totalorder %s2726_s5, %s2168_s9 }
 0x2c5   : > { %p2175_p7 = por %p2174_p6, %p2173_p5 }
 0x2c7   : > { %p2176_p9 = pnand %p2175_p7, %p2169_p3 }
 0x2c9   : > { %2179 = shalt.err (!%p2176_p9)  }
 0x2ca   : > { %940 = dma.hbm_to_vmem [thread:$0]  %s927_s22, 16, %s938_s28, %s2710_s15 }
 0x2cb PF: > { %s1330_s14 = sshll.u32 %s3083_s21, 4  ;;  %s943_s26 = scalar_lea.sflag [#allocation3], %s3083_s21 }
 0x2cc   : > { %s942_s30 = scalar_lea.vmem [#allocation2], %s1330_s14 }
 0x2cd   : > { %2236 = dma.done.wait %s943_s26, 256 }
 0x2ce   : > { %2237 = vsyncadd %s943_s26, 4294967040  ;;  %s1370_s8 = sshll.u32 %s2256_s18, 8  ;;  %s971_s5 = sshll.u32 %s2382_s23, 4  ;;  %v947_v0 = vld [vmem:[%s942_s30] sm:$0xff]  ;;  %v948_v2 = vld [vmem:[%s942_s30 + $0x8] sm:$0xff]  ;;  %s2996_s5 = int_to_ptr.vmem [resolvable:$true] %s971_s5 }
 0x2cf   : > { %v949_v1 = vld [vmem:[#allocation6] sm:$0xff]  ;;  %v950_v4 = vld [vmem:[#allocation6 + $0x8] sm:$0xff]  ;;  %s2994_s29 = scalar_lea.hbm %s3050_s3, %s1370_s8  ;;  %s3069_s18 = sand.u32 1, %s2248_s16  }
 0x2d0   : > { %v951_v3 = vadd.f32 %v949_v1, %v947_v0  ;;  %v952_v5 = vadd.f32 %v950_v4, %v948_v2  ;;  %s3002_s21 = scalar_lea.sflag [#allocation8], %s3069_s18  ;;  %s2180_s17 = scalar_lea.vmem %s2996_s5, 256 }
 0x2d1   : > { %p2181_p12 = scmp.ne.s32.totalorder %s2996_s5, %s2180_s17  ;;  %s2272_s25 = smov [#allocation9]  }
 0x2d2   : > { %953 = vst [vmem:[%s2382_s23] sm:$0xff] %v951_v3  ;;  %954 = vst [vmem:[%s2382_s23 + $0x8] sm:$0xff] %v952_v5  ;;  %s2184_s10 = sshll.u32 %s2272_s25, 4  ;;  %s2185_s10 = int_to_ptr.vmem [resolvable:$false] %s2184_s10 }
 0x2d3   : > { %p2182_p10 = pnand %p2181_p12, %p2338_p4  ;;  %s2186_s6 = scalar_lea.vmem %s2185_s10, 512 }
 0x2d4   : > { %p2187_p13 = scmp.lt.s32.totalorder %s2996_s5, %s2185_s10  ;;  %p2188_p0 = scmp.lt.s32.totalorder %s2186_s6, %s2180_s17 }
 0x2d5   : > { %p2183_p11 = pneg %p2182_p10 }
 0x2d6   : > { %p2189_p1 = por %p2188_p0, %p2187_p13 }
 0x2d8   : > { %p2190_p2 = pnand %p2189_p1, %p2183_p11 }
 0x2da   : > { %2193 = shalt.err (!%p2190_p2)
}
 0x2db   : > { %s2194_s23 = scalar_lea.hbm %s2994_s29, 256  ;;  %s2198_s28 = scalar_lea.hbm %s3050_s3, 512 }
 0x2dc   : > { %p2195_p3 = scmp.ne.s32.totalorder %s2994_s29, %s2194_s23  ;;  %p2199_p7 = scmp.lt.s32.totalorder %s2994_s29, %s3050_s3 }
 0x2dd   : > { %p2200_p9 = scmp.lt.s32.totalorder %s2198_s28, %s2194_s23 }
 0x2de   : > { %p2196_p5 = pnand %p2195_p3, %p2338_p4 }
 0x2df   : > { %p2201_p12 = por %p2200_p9, %p2199_p7 }
 0x2e0   : > { %p2197_p6 = pneg %p2196_p5 }
 0x2e2   : > { %p2202_p10 = pnand %p2201_p12, %p2197_p6 }
 0x2e4   : > { %2205 = shalt.err (!%p2202_p10)
}
 0x2e5   : > { %s2273_s27 = smov 128   ;;  %s2274_s22 = smov 8  }
 0x2e6   : > { %1375 = dma.vmem_to_hbm [thread:$0]  (%p2338_p4), %s2996_s5, 256, %s2994_s29, %s3002_s21, %s2273_s27, %s2273_s27, %s2274_s22  }
 0x2e7 PF: > { %s3070_s12 = sld [smem:[#allocation80_spill]]  ;;  %p1387_p11 = scmp.ge.s32.totalorder %s2264_s20, 2 }
 0x2e9   : > { %p1382_p13 = pnand %p1387_p11, %p2345_p8 }
 0x2eb   : > { %p1383_p0 = pneg %p1382_p13 }
 0x2ed   : > { %s986_s13 = sand.u32 1, %s3070_s12  }
 0x2ee   : > { %s987_s9 = scalar_lea.sflag [#allocation8], %s986_s13 }
 0x2ef   : > { %2239 = dma.done.wait (%p1383_p0), %s987_s9, 256  }
 0x2f0   : > { %2241 = vsyncadd (%p1383_p0), %s987_s9, 4294967040  ;;  %s21_s20 = sadd.s32 1, %s2264_s20   ;;  %s3072_s14 = sld [smem:[#allocation81_spill]] }
 0x2f1   : > { %p18_p1 = scmp.ge.s32.totalorder %s21_s20, 4   ;;  %s3073_s17 = sld [smem:[#allocation85_spill]] }
 0x2f2   : > { %s3074_s18 = sld [smem:[#allocation82_spill]]  ;;  %s3076_s15 = smov %s2248_s16 }
 0x2f3   : > { %s3075_s19 = sld [smem:[#allocation83_spill]]  ;;  %20 = sbr.rel (!%p18_p1) target bundleno = 11 (0xb), region = 267 }
 0x2f6   : > { %s3077_s16 = smov %s3072_s14 }
 0x2f8   :  { %992 = vsyncpa [#allocation7], 1 }
 0x2f9   :  { %994 = vsyncpa [#allocation7 + $0x1], 1 }
 0x2fa   :  { %995 = vsyncpa [#allocation8], 1 }
 0x2fb   :  { %997 = vsyncpa [#allocation8 + $0x1], 1 }
 0x2fc   :  { %998 = vsyncmov [#allocation3] }
 0x2ff   :  { %s999_s24 = vpop.sfrf %998 }
 0x300   :  { %p1336_p4 = scmp.ne.s32.totalorder %s999_s24, 0 }
 0x302   :  { %1003 = shalt.err (%p1336_p4)  }
 0x303   :  { %1005 = vsyncmov [#allocation3 + $0x1] }
 0x306   :  { %s1006_s30 = vpop.sfrf %1005 }
 0x307   :  { %p1337_p8 = scmp.ne.s32.totalorder %s1006_s30, 0 }
 0x309   :  { %1010 = shalt.err (%p1337_p8)  }

</bundles_post_ra>
